<compile_context>
chip_gen: v7x
topology: tpu7x:2x2x1
jax: 0.10.0
libtpu: 0.0.40
codegen_flags: <defaults>
</compile_context>

<pallas_src>
import functools
import math

import numpy as np
import jax
import jax.numpy as jnp
from jax import lax
from jax.experimental import pallas as pl
from jax.experimental.pallas import tpu as pltpu

_NEG_SLOPE = 0.2
_ACT_SCALE = math.sqrt(2.0)


# ------------------------------- Pallas kernel -------------------------------

def _resblock_kernel(x_ref, w1_ref, w2_ref, ws_ref, b1_ref, b2_ref, m_ref,
                     o_ref, y1p_ref, *, Wf, Mo, R2, skip_gain):
    """Fused ResBlock_cond forward for one batch element.

    Layout: 2x2 space-to-depth, flattened super-rows.
      x_ref  : (1, Mq, 4*Cin) f32   padded input, Mq = (Ho+2)*Wf, Wf = Wo+2
      w1_ref : (4, 4*Cin, 4*Cin) bf16  conv1 packed super-taps
      w2_ref : (9, 4*Cin, Cout)  bf16  blur∘conv2 (6x6 s2) packed super-taps
      ws_ref : (4, 4*Cin, Cout)  bf16  blur∘skip  (4x4 s2) packed super-taps
      b1_ref : (1, 4*Cin) f32, b2_ref : (1, Cout) f32
      m_ref  : (Mo, 1) f32   mask zeroing the flat-row wrap ("junk") columns
      o_ref  : (1, Mo, Cout) f32
      y1p_ref: (R2, 4*Cin) f32 VMEM scratch holding zero-padded conv1 output
    A shift of one super-pixel (a, b) is a flat offset a*Wf + b.
    """
    K4 = x_ref.shape[2]
    Cout = o_ref.shape[2]

    # ---- conv1 (3x3, pad 1) + FusedLeakyReLU, and the skip conv, share the
    # ---- same 4 shifted input reads (offsets a,b in {0,1}).
    acc1 = jnp.zeros((Mo, K4), jnp.float32)
    acc3 = jnp.zeros((Mo, Cout), jnp.float32)
    for a in range(2):
        for b in range(2):
            xt = x_ref[0, pl.ds(a * Wf + b, Mo), :].astype(jnp.bfloat16)
            acc1 = acc1 + jnp.dot(xt, w1_ref[2 * a + b],
                                  preferred_element_type=jnp.float32)
            acc3 = acc3 + jnp.dot(xt, ws_ref[2 * a + b],
                                  preferred_element_type=jnp.float32)

    acc1 = acc1 + b1_ref[...]
    y1 = jnp.where(acc1 >= 0.0, acc1, _NEG_SLOPE * acc1) * _ACT_SCALE
    # zero the wrap-around junk columns so they act as genuine zero padding
    y1 = y1 * m_ref[...]

    # ---- materialize y1 with a 1-super-pixel (= 2 pixel) zero border in VMEM
    top = Wf + 1
    y1p_ref[pl.ds(0, top), :] = jnp.zeros((top, K4), jnp.float32)
    y1p_ref[pl.ds(top, Mo), :] = y1
    y1p_ref[pl.ds(top + Mo, R2 - top - Mo), :] = (
        jnp.zeros((R2 - top - Mo, K4), jnp.float32))

    # ---- main path: blur(pad 2) + 3x3 stride-2 conv == 6x6 stride-2 conv,
    # ---- i.e. 9 shifted matmuls with K = 4*Cin; then bias + FusedLeakyReLU.
    acc2 = jnp.zeros((Mo, Cout), jnp.float32)
    for a in range(3):
        for b in range(3):
            yt = y1p_ref[pl.ds(a * Wf + b, Mo), :].astype(jnp.bfloat16)
            acc2 = acc2 + jnp.dot(yt, w2_ref[3 * a + b],
                                  preferred_element_type=jnp.float32)
    acc2 = acc2 + b2_ref[...]
    main = jnp.where(acc2 >= 0.0, acc2, _NEG_SLOPE * acc2) * _ACT_SCALE

    inv = 1.0 / math.sqrt(skip_gain ** 2 + 1.0)
    o_ref[0, :, :] = (main * skip_gain + acc3) * inv


# --------------------------- host-side weight packing ---------------------------

def _pack_weights(params, in_channel, out_channel):
    """Fold blur into conv weights and repack everything for the 2x2
    space-to-depth layout (lane order = (sub_row, sub_col, channel))."""
    Cin, Cout = in_channel, out_channel
    w1, b1 = params["w1"], params["b1"]      # (Cin,Cin,3,3), (Cin,)
    w2, b2 = params["w2"], params["b2"]      # (Cout,Cin,3,3), (Cout,)
    ws = params["ws"]                        # (Cout,Cin,1,1)

    s1 = 1.0 / math.sqrt(Cin * 9)
    s2 = 1.0 / math.sqrt(Cin * 9)
    ss = 1.0 / math.sqrt(Cin)

    # normalized [1,3,3,1] blur kernel, flipped (it is symmetric, flip == id)
    k1d = np.array([1.0, 3.0, 3.0, 1.0], np.float32)
    k2d = np.outer(k1d, k1d)
    k2d /= k2d.sum()
    kf = jnp.asarray(k2d[::-1, ::-1].copy())

    w1s = w1 * s1
    w2s = w2 * s2
    wss = ws.reshape(Cout, Cin) * ss

    # conv1 (3x3 stride-1 pad-1): pack into 4 super-taps of (4Cin -> 4Cin).
    w1x = jnp.zeros((Cin, Cin, 2, 2, 4, 4), jnp.float32)
    for s in range(2):
        for t in range(2):
            w1x = w1x.at[:, :, s, t, s:s + 3, t:t + 3].set(w1s)
    w1x = w1x.reshape(Cin, Cin, 2, 2, 2, 2, 2, 2)        # (o,c,s,t,a,p,b,q)
    w1big = jnp.transpose(w1x, (4, 6, 5, 7, 1, 2, 3, 0)).reshape(4, 4 * Cin, 4 * Cin)

    # main path: blur(pad2) ∘ 3x3 stride-2  ==  6x6 stride-2 conv (w2e).
    w2e = jnp.zeros((Cout, Cin, 6, 6), jnp.float32)
    for qy in range(4):
        for qx in range(4):
            w2e = w2e.at[:, :, qy:qy + 3, qx:qx + 3].add(w2s * kf[qy, qx])
    w2e = w2e.reshape(Cout, Cin, 3, 2, 3, 2)             # (o,i,a,p,b,q)
    w2big = jnp.transpose(w2e, (2, 4, 3, 5, 1, 0)).reshape(9, 4 * Cin, Cout)

    # skip path: blur(pad1) ∘ 1x1 stride-2  ==  4x4 stride-2 conv (wse).
    wse = wss[:, :, None, None] * kf[None, None, :, :]   # (o,i,4,4)
    wse = wse.reshape(Cout, Cin, 2, 2, 2, 2)             # (o,i,a,p,b,q)
    wsbig = jnp.transpose(wse, (2, 4, 3, 5, 1, 0)).reshape(4, 4 * Cin, Cout)

    b1t = jnp.tile(b1, 4).reshape(1, 4 * Cin).astype(jnp.float32)
    b2t = b2.reshape(1, Cout).astype(jnp.float32)
    return (w1big.astype(jnp.bfloat16), w2big.astype(jnp.bfloat16),
            wsbig.astype(jnp.bfloat16), b1t, b2t)


def _prep_input(x):
    """NCHW -> padded, 2x2 space-to-depth, flattened super-rows (one copy)."""
    N, C, H, W = x.shape
    Ho, Wo = H // 2, W // 2
    Wf, Hq = Wo + 2, Ho + 2
    xp = jnp.pad(x, ((0, 0), (0, 0), (1, 3), (1, 3)))      # (N,C,H+4,W+4)
    xs = xp.reshape(N, C, Hq, 2, Wf, 2)
    xs = jnp.transpose(xs, (0, 2, 4, 3, 5, 1))             # (N,Hq,Wf,2,2,C)
    return xs.reshape(N, Hq * Wf, 4 * C).astype(jnp.float32)


# ------------------------------- module forward -------------------------------

def resblock_cond_forward(x, params, skip_gain=1.0):
    """x: (N, Cin, H, W) float32 -> (N, Cout, H//2, W//2) float32."""
    N, Cin, H, W = x.shape
    Cout = params["w2"].shape[0]
    assert H % 2 == 0 and W % 2 == 0
    Ho, Wo = H // 2, W // 2
    Wf, Hq = Wo + 2, Ho + 2
    Mq = Hq * Wf
    Mo = Ho * Wf
    K4 = 4 * Cin
    R2 = (Ho + 3) * Wf

    w1big, w2big, wsbig, b1t, b2t = _pack_weights(params, Cin, Cout)
    xs = _prep_input(x)
    mask = jnp.asarray(
        (np.arange(Mo) % Wf < Wo).astype(np.float32)).reshape(Mo, 1)

    kernel = functools.partial(_resblock_kernel, Wf=Wf, Mo=Mo, R2=R2,
                               skip_gain=float(skip_gain))

    flops = int(N * 2 * Mo * K4 * (4 * K4 + 13 * Cout))
    bytes_accessed = int(xs.size * 4 + (w1big.size + w2big.size + wsbig.size) * 2
                         + (b1t.size + b2t.size + mask.size) * 4
                         + N * Mo * Cout * 4)

    outf = pl.pallas_call(
        kernel,
        out_shape=jax.ShapeDtypeStruct((N, Mo, Cout), jnp.float32),
        grid=(N,),
        in_specs=[
            pl.BlockSpec((1, Mq, K4), lambda n: (n, 0, 0)),
            pl.BlockSpec((4, K4, K4), lambda n: (0, 0, 0)),
            pl.BlockSpec((9, K4, Cout), lambda n: (0, 0, 0)),
            pl.BlockSpec((4, K4, Cout), lambda n: (0, 0, 0)),
            pl.BlockSpec((1, K4), lambda n: (0, 0)),
            pl.BlockSpec((1, Cout), lambda n: (0, 0)),
            pl.BlockSpec((Mo, 1), lambda n: (0, 0)),
        ],
        out_specs=pl.BlockSpec((1, Mo, Cout), lambda n: (n, 0, 0)),
        scratch_shapes=[pltpu.VMEM((R2, K4), jnp.float32)],
        compiler_params=pltpu.CompilerParams(
            dimension_semantics=("parallel",)),
        cost_estimate=pl.CostEstimate(flops=flops, transcendentals=0,
                                      bytes_accessed=bytes_accessed),
    )(xs, w1big, w2big, wsbig, b1t, b2t, mask)

    # drop the 2 wrap columns per output super-row, fused with the NCHW transpose
    out = outf.reshape(N, Ho, Wf, Cout)[:, :, :Wo, :]
    return jnp.transpose(out, (0, 3, 1, 2))


def init_params(key, in_channel, out_channel):
    k1, k2, k3, k4, k5 = jax.random.split(key, 5)
    return {
        # EqualConv2d weights ~ randn; small random biases to exercise the path.
        "w1": jax.random.normal(k1, (in_channel, in_channel, 3, 3), jnp.float32),
        "b1": 0.1 * jax.random.normal(k4, (in_channel,), jnp.float32),
        "w2": jax.random.normal(k2, (out_channel, in_channel, 3, 3), jnp.float32),
        "b2": 0.1 * jax.random.normal(k5, (out_channel,), jnp.float32),
        "ws": jax.random.normal(k3, (out_channel, in_channel, 1, 1), jnp.float32),
    }


# ----------------------------- pure-JAX f32 reference -----------------------------

def _ref_forward(x, params, skip_gain=1.0):
    """Faithful f32 re-implementation of the PyTorch module (blur kept separate)."""
    w1, b1, w2, b2, ws = (params[k] for k in ("w1", "b1", "w2", "b2", "ws"))
    N, Cin, H, W = x.shape
    dn = ("NCHW", "OIHW", "NCHW")
    k1d = np.array([1.0, 3.0, 3.0, 1.0], np.float32)
    k2d = np.outer(k1d, k1d)
    k2d /= k2d.sum()
    kflip = jnp.asarray(k2d[::-1, ::-1].copy())

    def blur(z, pad):
        C = z.shape[1]
        kw = jnp.broadcast_to(kflip, (C, 1, 4, 4))
        return lax.conv_general_dilated(z, kw, (1, 1), [pad, pad],
                                        dimension_numbers=dn,
                                        feature_group_count=C)

    def lrelu(z, b):
        z = z + b.reshape(1, -1, 1, 1)
        return jnp.where(z >= 0, z, _NEG_SLOPE * z) * _ACT_SCALE

    s1 = 1.0 / math.sqrt(Cin * 9)
    y = lax.conv_general_dilated(x, w1 * s1, (1, 1), [(1, 1), (1, 1)],
                                 dimension_numbers=dn)
    y = lrelu(y, b1)
    y = blur(y, (2, 2))
    s2 = 1.0 / math.sqrt(Cin * 9)
    y = lax.conv_general_dilated(y, w2 * s2, (2, 2), [(0, 0), (0, 0)],
                                 dimension_numbers=dn)
    y = lrelu(y, b2)
    sk = blur(x, (1, 1))
    ss = 1.0 / math.sqrt(Cin)
    sk = lax.conv_general_dilated(sk, ws * ss, (2, 2), [(0, 0), (0, 0)],
                                  dimension_numbers=dn)
    return (y * skip_gain + sk) / math.sqrt(skip_gain ** 2 + 1.0)


# ----------------------------------- main -----------------------------------

if __name__ == "__main__":
    key = jax.random.PRNGKey(0)
    kx, kp = jax.random.split(key)
    N, Cin, Cout, H, W = 2, 8, 16, 16, 16

    x = jax.random.normal(kx, (N, Cin, H, W), jnp.float32)
    params = init_params(kp, Cin, Cout)

    fwd = jax.jit(functools.partial(resblock_cond_forward, skip_gain=1.0))
    out = jax.block_until_ready(fwd(x, params))
    assert out.shape == (N, Cout, H // 2, W // 2), out.shape

    ref = jax.block_until_ready(_ref_forward(x, params, skip_gain=1.0))
    # kernel uses bf16 MXU operands (and blur folded into the weights); the
    # reference is pure f32, so allow bf16-level tolerance.
    np.testing.assert_allclose(np.asarray(out), np.asarray(ref),
                               rtol=5e-2, atol=5e-2)
    print("KERNEL_OK")
</pallas_src>

<mosaic_0001>
module attributes {stable_mosaic.version = 11 : i64} {
  func.func @_resblock_kernel(%arg0: i32, %arg1: memref<1x100x32xf32, #tpu.memory_space<vmem>>, %arg2: memref<4x32x32xbf16, #tpu.memory_space<vmem>>, %arg3: memref<9x32x16xbf16, #tpu.memory_space<vmem>>, %arg4: memref<4x32x16xbf16, #tpu.memory_space<vmem>>, %arg5: memref<1x32xf32, #tpu.memory_space<vmem>>, %arg6: memref<1x16xf32, #tpu.memory_space<vmem>>, %arg7: memref<80x1xf32, #tpu.memory_space<vmem>>, %arg8: memref<1x80x16xf32, #tpu.memory_space<vmem>>, %arg9: memref<110x32xf32, #tpu.memory_space<vmem>>) attributes {dimension_semantics = [#tpu.dimension_semantics<parallel>], iteration_bounds = array<i64: 2>, scalar_prefetch = 0 : i64, scratch_operands = 1 : i64, tpu.core_type = #tpu.core_type<tc>, window_params = [{transform_indices = @transform_0, window_bounds = array<i64: 1, 100, 32>}, {pipeline_mode = #tpu.pipeline_mode<synchronous>, transform_indices = @transform_1, window_bounds = array<i64: 4, 32, 32>}, {pipeline_mode = #tpu.pipeline_mode<synchronous>, transform_indices = @transform_2, window_bounds = array<i64: 9, 32, 16>}, {pipeline_mode = #tpu.pipeline_mode<synchronous>, transform_indices = @transform_3, window_bounds = array<i64: 4, 32, 16>}, {pipeline_mode = #tpu.pipeline_mode<synchronous>, transform_indices = @transform_4, window_bounds = array<i64: 1, 32>}, {pipeline_mode = #tpu.pipeline_mode<synchronous>, transform_indices = @transform_5, window_bounds = array<i64: 1, 16>}, {pipeline_mode = #tpu.pipeline_mode<synchronous>, transform_indices = @transform_6, window_bounds = array<i64: 80, 1>}, {transform_indices = @transform_7, window_bounds = array<i64: 1, 80, 16>}]} {
    %cst = arith.constant 0.000000e+00 : f32
    %0 = vector.broadcast %cst : f32 to vector<80x32xf32>
    %cst_0 = arith.constant 0.000000e+00 : f32
    %1 = vector.broadcast %cst_0 : f32 to vector<80x16xf32>
    %c0 = arith.constant 0 : index
    %c0_1 = arith.constant 0 : index
    %c0_2 = arith.constant 0 : index
    %2 = vector.load %arg1[%c0, %c0_1, %c0_2] : memref<1x100x32xf32, #tpu.memory_space<vmem>>, vector<1x80x32xf32>
    %3 = vector.shape_cast %2 : vector<1x80x32xf32> to vector<80x32xf32>
    %4 = arith.truncf %3 : vector<80x32xf32> to vector<80x32xbf16>
    %c0_3 = arith.constant 0 : index
    %c0_4 = arith.constant 0 : index
    %c0_5 = arith.constant 0 : index
    %5 = vector.load %arg2[%c0_3, %c0_4, %c0_5] : memref<4x32x32xbf16, #tpu.memory_space<vmem>>, vector<1x32x32xbf16>
    %6 = vector.shape_cast %5 : vector<1x32x32xbf16> to vector<32x32xbf16>
    %cst_6 = arith.constant dense<0.000000e+00> : vector<80x32xf32>
    %7 = tpu.matmul %4, %6, %cst_6 {dimension_numbers = #tpu.dot_dimension_numbers<[1], [0], [0], [1], [0, 0, 1, 1], [], []>} : vector<80x32xbf16>, vector<32x32xbf16>, vector<80x32xf32> -> vector<80x32xf32>
    %8 = arith.addf %0, %7 : vector<80x32xf32>
    %c0_7 = arith.constant 0 : index
    %c0_8 = arith.constant 0 : index
    %c0_9 = arith.constant 0 : index
    %9 = vector.load %arg4[%c0_7, %c0_8, %c0_9] : memref<4x32x16xbf16, #tpu.memory_space<vmem>>, vector<1x32x16xbf16>
    %10 = vector.shape_cast %9 : vector<1x32x16xbf16> to vector<32x16xbf16>
    %cst_10 = arith.constant dense<0.000000e+00> : vector<80x16xf32>
    %11 = tpu.matmul %4, %10, %cst_10 {dimension_numbers = #tpu.dot_dimension_numbers<[1], [0], [0], [1], [0, 0, 1, 1], [], []>} : vector<80x32xbf16>, vector<32x16xbf16>, vector<80x16xf32> -> vector<80x16xf32>
    %12 = arith.addf %1, %11 : vector<80x16xf32>
    %c0_11 = arith.constant 0 : index
    %c1 = arith.constant 1 : index
    %c0_12 = arith.constant 0 : index
    %13 = vector.load %arg1[%c0_11, %c1, %c0_12] : memref<1x100x32xf32, #tpu.memory_space<vmem>>, vector<1x80x32xf32>
    %14 = vector.shape_cast %13 : vector<1x80x32xf32> to vector<80x32xf32>
    %15 = arith.truncf %14 : vector<80x32xf32> to vector<80x32xbf16>
    %c1_13 = arith.constant 1 : index
    %c0_14 = arith.constant 0 : index
    %c0_15 = arith.constant 0 : index
    %16 = vector.load %arg2[%c1_13, %c0_14, %c0_15] : memref<4x32x32xbf16, #tpu.memory_space<vmem>>, vector<1x32x32xbf16>
    %17 = vector.shape_cast %16 : vector<1x32x32xbf16> to vector<32x32xbf16>
    %cst_16 = arith.constant dense<0.000000e+00> : vector<80x32xf32>
    %18 = tpu.matmul %15, %17, %cst_16 {dimension_numbers = #tpu.dot_dimension_numbers<[1], [0], [0], [1], [0, 0, 1, 1], [], []>} : vector<80x32xbf16>, vector<32x32xbf16>, vector<80x32xf32> -> vector<80x32xf32>
    %19 = arith.addf %8, %18 : vector<80x32xf32>
    %c1_17 = arith.constant 1 : index
    %c0_18 = arith.constant 0 : index
    %c0_19 = arith.constant 0 : index
    %20 = vector.load %arg4[%c1_17, %c0_18, %c0_19] : memref<4x32x16xbf16, #tpu.memory_space<vmem>>, vector<1x32x16xbf16>
    %21 = vector.shape_cast %20 : vector<1x32x16xbf16> to vector<32x16xbf16>
    %cst_20 = arith.constant dense<0.000000e+00> : vector<80x16xf32>
    %22 = tpu.matmul %15, %21, %cst_20 {dimension_numbers = #tpu.dot_dimension_numbers<[1], [0], [0], [1], [0, 0, 1, 1], [], []>} : vector<80x32xbf16>, vector<32x16xbf16>, vector<80x16xf32> -> vector<80x16xf32>
    %23 = arith.addf %12, %22 : vector<80x16xf32>
    %c0_21 = arith.constant 0 : index
    %c10 = arith.constant 10 : index
    %c0_22 = arith.constant 0 : index
    %24 = vector.load %arg1[%c0_21, %c10, %c0_22] : memref<1x100x32xf32, #tpu.memory_space<vmem>>, vector<1x80x32xf32>
    %25 = vector.shape_cast %24 : vector<1x80x32xf32> to vector<80x32xf32>
    %26 = arith.truncf %25 : vector<80x32xf32> to vector<80x32xbf16>
    %c2 = arith.constant 2 : index
    %c0_23 = arith.constant 0 : index
    %c0_24 = arith.constant 0 : index
    %27 = vector.load %arg2[%c2, %c0_23, %c0_24] : memref<4x32x32xbf16, #tpu.memory_space<vmem>>, vector<1x32x32xbf16>
    %28 = vector.shape_cast %27 : vector<1x32x32xbf16> to vector<32x32xbf16>
    %cst_25 = arith.constant dense<0.000000e+00> : vector<80x32xf32>
    %29 = tpu.matmul %26, %28, %cst_25 {dimension_numbers = #tpu.dot_dimension_numbers<[1], [0], [0], [1], [0, 0, 1, 1], [], []>} : vector<80x32xbf16>, vector<32x32xbf16>, vector<80x32xf32> -> vector<80x32xf32>
    %30 = arith.addf %19, %29 : vector<80x32xf32>
    %c2_26 = arith.constant 2 : index
    %c0_27 = arith.constant 0 : index
    %c0_28 = arith.constant 0 : index
    %31 = vector.load %arg4[%c2_26, %c0_27, %c0_28] : memref<4x32x16xbf16, #tpu.memory_space<vmem>>, vector<1x32x16xbf16>
    %32 = vector.shape_cast %31 : vector<1x32x16xbf16> to vector<32x16xbf16>
    %cst_29 = arith.constant dense<0.000000e+00> : vector<80x16xf32>
    %33 = tpu.matmul %26, %32, %cst_29 {dimension_numbers = #tpu.dot_dimension_numbers<[1], [0], [0], [1], [0, 0, 1, 1], [], []>} : vector<80x32xbf16>, vector<32x16xbf16>, vector<80x16xf32> -> vector<80x16xf32>
    %34 = arith.addf %23, %33 : vector<80x16xf32>
    %c0_30 = arith.constant 0 : index
    %c11 = arith.constant 11 : index
    %c0_31 = arith.constant 0 : index
    %35 = vector.load %arg1[%c0_30, %c11, %c0_31] : memref<1x100x32xf32, #tpu.memory_space<vmem>>, vector<1x80x32xf32>
    %36 = vector.shape_cast %35 : vector<1x80x32xf32> to vector<80x32xf32>
    %37 = arith.truncf %36 : vector<80x32xf32> to vector<80x32xbf16>
    %c3 = arith.constant 3 : index
    %c0_32 = arith.constant 0 : index
    %c0_33 = arith.constant 0 : index
    %38 = vector.load %arg2[%c3, %c0_32, %c0_33] : memref<4x32x32xbf16, #tpu.memory_space<vmem>>, vector<1x32x32xbf16>
    %39 = vector.shape_cast %38 : vector<1x32x32xbf16> to vector<32x32xbf16>
    %cst_34 = arith.constant dense<0.000000e+00> : vector<80x32xf32>
    %40 = tpu.matmul %37, %39, %cst_34 {dimension_numbers = #tpu.dot_dimension_numbers<[1], [0], [0], [1], [0, 0, 1, 1], [], []>} : vector<80x32xbf16>, vector<32x32xbf16>, vector<80x32xf32> -> vector<80x32xf32>
    %41 = arith.addf %30, %40 : vector<80x32xf32>
    %c3_35 = arith.constant 3 : index
    %c0_36 = arith.constant 0 : index
    %c0_37 = arith.constant 0 : index
    %42 = vector.load %arg4[%c3_35, %c0_36, %c0_37] : memref<4x32x16xbf16, #tpu.memory_space<vmem>>, vector<1x32x16xbf16>
    %43 = vector.shape_cast %42 : vector<1x32x16xbf16> to vector<32x16xbf16>
    %cst_38 = arith.constant dense<0.000000e+00> : vector<80x16xf32>
    %44 = tpu.matmul %37, %43, %cst_38 {dimension_numbers = #tpu.dot_dimension_numbers<[1], [0], [0], [1], [0, 0, 1, 1], [], []>} : vector<80x32xbf16>, vector<32x16xbf16>, vector<80x16xf32> -> vector<80x16xf32>
    %45 = arith.addf %34, %44 : vector<80x16xf32>
    %c0_39 = arith.constant 0 : index
    %c0_40 = arith.constant 0 : index
    %46 = vector.load %arg5[%c0_39, %c0_40] : memref<1x32xf32, #tpu.memory_space<vmem>>, vector<1x32xf32>
    %47 = vector.broadcast %46 : vector<1x32xf32> to vector<80x32xf32>
    %48 = arith.addf %41, %47 : vector<80x32xf32>
    %cst_41 = arith.constant 0.000000e+00 : f32
    %49 = vector.broadcast %cst_41 : f32 to vector<80x32xf32>
    %50 = arith.cmpf oge, %48, %49 : vector<80x32xf32>
    %cst_42 = arith.constant 2.000000e-01 : f32
    %51 = vector.broadcast %cst_42 : f32 to vector<80x32xf32>
    %52 = arith.mulf %51, %48 : vector<80x32xf32>
    %53 = arith.select %50, %48, %52 : vector<80x32xi1>, vector<80x32xf32>
    %cst_43 = arith.constant 1.41421354 : f32
    %54 = vector.broadcast %cst_43 : f32 to vector<80x32xf32>
    %55 = arith.mulf %53, %54 : vector<80x32xf32>
    %c0_44 = arith.constant 0 : index
    %c0_45 = arith.constant 0 : index
    %56 = vector.load %arg7[%c0_44, %c0_45] : memref<80x1xf32, #tpu.memory_space<vmem>>, vector<80x1xf32>
    %57 = vector.broadcast %56 : vector<80x1xf32> to vector<80x32xf32>
    %58 = arith.mulf %55, %57 : vector<80x32xf32>
    %cst_46 = arith.constant 0.000000e+00 : f32
    %59 = vector.broadcast %cst_46 : f32 to vector<11x32xf32>
    %c0_47 = arith.constant 0 : index
    %c0_48 = arith.constant 0 : index
    %60 = vector.load %arg9[%c0_47, %c0_48] : memref<110x32xf32, #tpu.memory_space<vmem>>, vector<11x32xf32>
    tpu.vector_store %arg9[%c0_47, %c0_48], %59 {strides = array<i32>} : memref<110x32xf32, #tpu.memory_space<vmem>>, vector<11x32xf32>,
    %c11_49 = arith.constant 11 : index
    %c0_50 = arith.constant 0 : index
    %61 = vector.load %arg9[%c11_49, %c0_50] : memref<110x32xf32, #tpu.memory_space<vmem>>, vector<80x32xf32>
    tpu.vector_store %arg9[%c11_49, %c0_50], %58 {strides = array<i32>} : memref<110x32xf32, #tpu.memory_space<vmem>>, vector<80x32xf32>,
    %cst_51 = arith.constant 0.000000e+00 : f32
    %62 = vector.broadcast %cst_51 : f32 to vector<19x32xf32>
    %c91 = arith.constant 91 : index
    %c0_52 = arith.constant 0 : index
    %63 = vector.load %arg9[%c91, %c0_52] : memref<110x32xf32, #tpu.memory_space<vmem>>, vector<19x32xf32>
    tpu.vector_store %arg9[%c91, %c0_52], %62 {strides = array<i32>} : memref<110x32xf32, #tpu.memory_space<vmem>>, vector<19x32xf32>,
    %cst_53 = arith.constant 0.000000e+00 : f32
    %64 = vector.broadcast %cst_53 : f32 to vector<80x16xf32>
    %c0_54 = arith.constant 0 : index
    %c0_55 = arith.constant 0 : index
    %65 = vector.load %arg9[%c0_54, %c0_55] : memref<110x32xf32, #tpu.memory_space<vmem>>, vector<80x32xf32>
    %66 = arith.truncf %65 : vector<80x32xf32> to vector<80x32xbf16>
    %c0_56 = arith.constant 0 : index
    %c0_57 = arith.constant 0 : index
    %c0_58 = arith.constant 0 : index
    %67 = vector.load %arg3[%c0_56, %c0_57, %c0_58] : memref<9x32x16xbf16, #tpu.memory_space<vmem>>, vector<1x32x16xbf16>
    %68 = vector.shape_cast %67 : vector<1x32x16xbf16> to vector<32x16xbf16>
    %cst_59 = arith.constant dense<0.000000e+00> : vector<80x16xf32>
    %69 = tpu.matmul %66, %68, %cst_59 {dimension_numbers = #tpu.dot_dimension_numbers<[1], [0], [0], [1], [0, 0, 1, 1], [], []>} : vector<80x32xbf16>, vector<32x16xbf16>, vector<80x16xf32> -> vector<80x16xf32>
    %70 = arith.addf %64, %69 : vector<80x16xf32>
    %c1_60 = arith.constant 1 : index
    %c0_61 = arith.constant 0 : index
    %71 = vector.load %arg9[%c1_60, %c0_61] : memref<110x32xf32, #tpu.memory_space<vmem>>, vector<80x32xf32>
    %72 = arith.truncf %71 : vector<80x32xf32> to vector<80x32xbf16>
    %c1_62 = arith.constant 1 : index
    %c0_63 = arith.constant 0 : index
    %c0_64 = arith.constant 0 : index
    %73 = vector.load %arg3[%c1_62, %c0_63, %c0_64] : memref<9x32x16xbf16, #tpu.memory_space<vmem>>, vector<1x32x16xbf16>
    %74 = vector.shape_cast %73 : vector<1x32x16xbf16> to vector<32x16xbf16>
    %cst_65 = arith.constant dense<0.000000e+00> : vector<80x16xf32>
    %75 = tpu.matmul %72, %74, %cst_65 {dimension_numbers = #tpu.dot_dimension_numbers<[1], [0], [0], [1], [0, 0, 1, 1], [], []>} : vector<80x32xbf16>, vector<32x16xbf16>, vector<80x16xf32> -> vector<80x16xf32>
    %76 = arith.addf %70, %75 : vector<80x16xf32>
    %c2_66 = arith.constant 2 : index
    %c0_67 = arith.constant 0 : index
    %77 = vector.load %arg9[%c2_66, %c0_67] : memref<110x32xf32, #tpu.memory_space<vmem>>, vector<80x32xf32>
    %78 = arith.truncf %77 : vector<80x32xf32> to vector<80x32xbf16>
    %c2_68 = arith.constant 2 : index
    %c0_69 = arith.constant 0 : index
    %c0_70 = arith.constant 0 : index
    %79 = vector.load %arg3[%c2_68, %c0_69, %c0_70] : memref<9x32x16xbf16, #tpu.memory_space<vmem>>, vector<1x32x16xbf16>
    %80 = vector.shape_cast %79 : vector<1x32x16xbf16> to vector<32x16xbf16>
    %cst_71 = arith.constant dense<0.000000e+00> : vector<80x16xf32>
    %81 = tpu.matmul %78, %80, %cst_71 {dimension_numbers = #tpu.dot_dimension_numbers<[1], [0], [0], [1], [0, 0, 1, 1], [], []>} : vector<80x32xbf16>, vector<32x16xbf16>, vector<80x16xf32> -> vector<80x16xf32>
    %82 = arith.addf %76, %81 : vector<80x16xf32>
    %c10_72 = arith.constant 10 : index
    %c0_73 = arith.constant 0 : index
    %83 = vector.load %arg9[%c10_72, %c0_73] : memref<110x32xf32, #tpu.memory_space<vmem>>, vector<80x32xf32>
    %84 = arith.truncf %83 : vector<80x32xf32> to vector<80x32xbf16>
    %c3_74 = arith.constant 3 : index
    %c0_75 = arith.constant 0 : index
    %c0_76 = arith.constant 0 : index
    %85 = vector.load %arg3[%c3_74, %c0_75, %c0_76] : memref<9x32x16xbf16, #tpu.memory_space<vmem>>, vector<1x32x16xbf16>
    %86 = vector.shape_cast %85 : vector<1x32x16xbf16> to vector<32x16xbf16>
    %cst_77 = arith.constant dense<0.000000e+00> : vector<80x16xf32>
    %87 = tpu.matmul %84, %86, %cst_77 {dimension_numbers = #tpu.dot_dimension_numbers<[1], [0], [0], [1], [0, 0, 1, 1], [], []>} : vector<80x32xbf16>, vector<32x16xbf16>, vector<80x16xf32> -> vector<80x16xf32>
    %88 = arith.addf %82, %87 : vector<80x16xf32>
    %c11_78 = arith.constant 11 : index
    %c0_79 = arith.constant 0 : index
    %89 = vector.load %arg9[%c11_78, %c0_79] : memref<110x32xf32, #tpu.memory_space<vmem>>, vector<80x32xf32>
    %90 = arith.truncf %89 : vector<80x32xf32> to vector<80x32xbf16>
    %c4 = arith.constant 4 : index
    %c0_80 = arith.constant 0 : index
    %c0_81 = arith.constant 0 : index
    %91 = vector.load %arg3[%c4, %c0_80, %c0_81] : memref<9x32x16xbf16, #tpu.memory_space<vmem>>, vector<1x32x16xbf16>
    %92 = vector.shape_cast %91 : vector<1x32x16xbf16> to vector<32x16xbf16>
    %cst_82 = arith.constant dense<0.000000e+00> : vector<80x16xf32>
    %93 = tpu.matmul %90, %92, %cst_82 {dimension_numbers = #tpu.dot_dimension_numbers<[1], [0], [0], [1], [0, 0, 1, 1], [], []>} : vector<80x32xbf16>, vector<32x16xbf16>, vector<80x16xf32> -> vector<80x16xf32>
    %94 = arith.addf %88, %93 : vector<80x16xf32>
    %c12 = arith.constant 12 : index
    %c0_83 = arith.constant 0 : index
    %95 = vector.load %arg9[%c12, %c0_83] : memref<110x32xf32, #tpu.memory_space<vmem>>, vector<80x32xf32>
    %96 = arith.truncf %95 : vector<80x32xf32> to vector<80x32xbf16>
    %c5 = arith.constant 5 : index
    %c0_84 = arith.constant 0 : index
    %c0_85 = arith.constant 0 : index
    %97 = vector.load %arg3[%c5, %c0_84, %c0_85] : memref<9x32x16xbf16, #tpu.memory_space<vmem>>, vector<1x32x16xbf16>
    %98 = vector.shape_cast %97 : vector<1x32x16xbf16> to vector<32x16xbf16>
    %cst_86 = arith.constant dense<0.000000e+00> : vector<80x16xf32>
    %99 = tpu.matmul %96, %98, %cst_86 {dimension_numbers = #tpu.dot_dimension_numbers<[1], [0], [0], [1], [0, 0, 1, 1], [], []>} : vector<80x32xbf16>, vector<32x16xbf16>, vector<80x16xf32> -> vector<80x16xf32>
    %100 = arith.addf %94, %99 : vector<80x16xf32>
    %c20 = arith.constant 20 : index
    %c0_87 = arith.constant 0 : index
    %101 = vector.load %arg9[%c20, %c0_87] : memref<110x32xf32, #tpu.memory_space<vmem>>, vector<80x32xf32>
    %102 = arith.truncf %101 : vector<80x32xf32> to vector<80x32xbf16>
    %c6 = arith.constant 6 : index
    %c0_88 = arith.constant 0 : index
    %c0_89 = arith.constant 0 : index
    %103 = vector.load %arg3[%c6, %c0_88, %c0_89] : memref<9x32x16xbf16, #tpu.memory_space<vmem>>, vector<1x32x16xbf16>
    %104 = vector.shape_cast %103 : vector<1x32x16xbf16> to vector<32x16xbf16>
    %cst_90 = arith.constant dense<0.000000e+00> : vector<80x16xf32>
    %105 = tpu.matmul %102, %104, %cst_90 {dimension_numbers = #tpu.dot_dimension_numbers<[1], [0], [0], [1], [0, 0, 1, 1], [], []>} : vector<80x32xbf16>, vector<32x16xbf16>, vector<80x16xf32> -> vector<80x16xf32>
    %106 = arith.addf %100, %105 : vector<80x16xf32>
    %c21 = arith.constant 21 : index
    %c0_91 = arith.constant 0 : index
    %107 = vector.load %arg9[%c21, %c0_91] : memref<110x32xf32, #tpu.memory_space<vmem>>, vector<80x32xf32>
    %108 = arith.truncf %107 : vector<80x32xf32> to vector<80x32xbf16>
    %c7 = arith.constant 7 : index
    %c0_92 = arith.constant 0 : index
    %c0_93 = arith.constant 0 : index
    %109 = vector.load %arg3[%c7, %c0_92, %c0_93] : memref<9x32x16xbf16, #tpu.memory_space<vmem>>, vector<1x32x16xbf16>
    %110 = vector.shape_cast %109 : vector<1x32x16xbf16> to vector<32x16xbf16>
    %cst_94 = arith.constant dense<0.000000e+00> : vector<80x16xf32>
    %111 = tpu.matmul %108, %110, %cst_94 {dimension_numbers = #tpu.dot_dimension_numbers<[1], [0], [0], [1], [0, 0, 1, 1], [], []>} : vector<80x32xbf16>, vector<32x16xbf16>, vector<80x16xf32> -> vector<80x16xf32>
    %112 = arith.addf %106, %111 : vector<80x16xf32>
    %c22 = arith.constant 22 : index
    %c0_95 = arith.constant 0 : index
    %113 = vector.load %arg9[%c22, %c0_95] : memref<110x32xf32, #tpu.memory_space<vmem>>, vector<80x32xf32>
    %114 = arith.truncf %113 : vector<80x32xf32> to vector<80x32xbf16>
    %c8 = arith.constant 8 : index
    %c0_96 = arith.constant 0 : index
    %c0_97 = arith.constant 0 : index
    %115 = vector.load %arg3[%c8, %c0_96, %c0_97] : memref<9x32x16xbf16, #tpu.memory_space<vmem>>, vector<1x32x16xbf16>
    %116 = vector.shape_cast %115 : vector<1x32x16xbf16> to vector<32x16xbf16>
    %cst_98 = arith.constant dense<0.000000e+00> : vector<80x16xf32>
    %117 = tpu.matmul %114, %116, %cst_98 {dimension_numbers = #tpu.dot_dimension_numbers<[1], [0], [0], [1], [0, 0, 1, 1], [], []>} : vector<80x32xbf16>, vector<32x16xbf16>, vector<80x16xf32> -> vector<80x16xf32>
    %118 = arith.addf %112, %117 : vector<80x16xf32>
    %c0_99 = arith.constant 0 : index
    %c0_100 = arith.constant 0 : index
    %119 = vector.load %arg6[%c0_99, %c0_100] : memref<1x16xf32, #tpu.memory_space<vmem>>, vector<1x16xf32>
    %120 = vector.broadcast %119 : vector<1x16xf32> to vector<80x16xf32>
    %121 = arith.addf %118, %120 : vector<80x16xf32>
    %cst_101 = arith.constant 0.000000e+00 : f32
    %122 = vector.broadcast %cst_101 : f32 to vector<80x16xf32>
    %123 = arith.cmpf oge, %121, %122 : vector<80x16xf32>
    %cst_102 = arith.constant 2.000000e-01 : f32
    %124 = vector.broadcast %cst_102 : f32 to vector<80x16xf32>
    %125 = arith.mulf %124, %121 : vector<80x16xf32>
    %126 = arith.select %123, %121, %125 : vector<80x16xi1>, vector<80x16xf32>
    %cst_103 = arith.constant 1.41421354 : f32
    %127 = vector.broadcast %cst_103 : f32 to vector<80x16xf32>
    %128 = arith.mulf %126, %127 : vector<80x16xf32>
    %cst_104 = arith.constant 1.000000e+00 : f32
    %129 = vector.broadcast %cst_104 : f32 to vector<80x16xf32>
    %130 = arith.mulf %128, %129 : vector<80x16xf32>
    %131 = arith.addf %130, %45 : vector<80x16xf32>
    %cst_105 = arith.constant 0.707106769 : f32
    %132 = vector.broadcast %cst_105 : f32 to vector<80x16xf32>
    %133 = arith.mulf %131, %132 : vector<80x16xf32>
    %c0_106 = arith.constant 0 : index
    %c0_107 = arith.constant 0 : index
    %c0_108 = arith.constant 0 : index
    %134 = vector.load %arg8[%c0_106, %c0_107, %c0_108] : memref<1x80x16xf32, #tpu.memory_space<vmem>>, vector<1x80x16xf32>
    %135 = vector.shape_cast %134 : vector<1x80x16xf32> to vector<80x16xf32>
    %136 = vector.shape_cast %133 : vector<80x16xf32> to vector<1x80x16xf32>
    tpu.vector_store %arg8[%c0_106, %c0_107, %c0_108], %136 {strides = array<i32>} : memref<1x80x16xf32, #tpu.memory_space<vmem>>, vector<1x80x16xf32>,
    return
  }
  func.func @transform_0(%arg0: i32) -> (i32, i32, i32) {
    %c0_i32 = arith.constant 0 : i32
    %c0_i32_0 = arith.constant 0 : i32
    %c0_i32_1 = arith.constant 0 : i32
    return %arg0, %c0_i32, %c0_i32_0 : i32, i32, i32
  }
  func.func @transform_1(%arg0: i32) -> (i32, i32, i32) {
    %c0_i32 = arith.constant 0 : i32
    %c0_i32_0 = arith.constant 0 : i32
    %c0_i32_1 = arith.constant 0 : i32
    %c0_i32_2 = arith.constant 0 : i32
    return %c0_i32, %c0_i32_0, %c0_i32_1 : i32, i32, i32
  }
  func.func @transform_2(%arg0: i32) -> (i32, i32, i32) {
    %c0_i32 = arith.constant 0 : i32
    %c0_i32_0 = arith.constant 0 : i32
    %c0_i32_1 = arith.constant 0 : i32
    %c0_i32_2 = arith.constant 0 : i32
    return %c0_i32, %c0_i32_0, %c0_i32_1 : i32, i32, i32
  }
  func.func @transform_3(%arg0: i32) -> (i32, i32, i32) {
    %c0_i32 = arith.constant 0 : i32
    %c0_i32_0 = arith.constant 0 : i32
    %c0_i32_1 = arith.constant 0 : i32
    %c0_i32_2 = arith.constant 0 : i32
    return %c0_i32, %c0_i32_0, %c0_i32_1 : i32, i32, i32
  }
  func.func @transform_4(%arg0: i32) -> (i32, i32) {
    %c0_i32 = arith.constant 0 : i32
    %c0_i32_0 = arith.constant 0 : i32
    %c0_i32_1 = arith.constant 0 : i32
    return %c0_i32, %c0_i32_0 : i32, i32
  }
  func.func @transform_5(%arg0: i32) -> (i32, i32) {
    %c0_i32 = arith.constant 0 : i32
    %c0_i32_0 = arith.constant 0 : i32
    %c0_i32_1 = arith.constant 0 : i32
    return %c0_i32, %c0_i32_0 : i32, i32
  }
  func.func @transform_6(%arg0: i32) -> (i32, i32) {
    %c0_i32 = arith.constant 0 : i32
    %c0_i32_0 = arith.constant 0 : i32
    %c0_i32_1 = arith.constant 0 : i32
    return %c0_i32, %c0_i32_0 : i32, i32
  }
  func.func @transform_7(%arg0: i32) -> (i32, i32, i32) {
    %c0_i32 = arith.constant 0 : i32
    %c0_i32_0 = arith.constant 0 : i32
    %c0_i32_1 = arith.constant 0 : i32
    return %arg0, %c0_i32, %c0_i32_0 : i32, i32, i32
  }
}

</mosaic_0001>

<bundles_post_ra>
// kernel: tile.8
= control target key start
LH: loop header
LB: loop body
LE: loop exit
PB: predicated region body
PF: predicated region fallthrough
CT: control target
= control target key end

     0   :  { %s22_s0 = inlined_call_operand.vmem [shape: f32[8], index: 0, kind: input, shape index: {}]   ;;  %s23_s1 = inlined_call_operand.vmem [shape: f32[4,8], index: 1, kind: output, shape index: {}]  }
   0x1   :  { %v4_v0 = vld [vmem:[%s22_s0] ss:$0 sm:$0xff] }
   0x2   :  { %5 = vst [vmem:[%s23_s1] sm:$0xf] %v4_v0 }

// kernel: tile.9
= control target key start
LH: loop header
LB: loop body
LE: loop exit
PB: predicated region body
PF: predicated region fallthrough
CT: control target
= control target key end

     0   :  { %vm7_vm0 = vcmask 64512   ;;  %s37_s8 = smov 8   ;;  %s38_s9 = smov 16   ;;  %vm13_vm1 = vcmask 261312   ;;  %vm19_vm2 = vcmask 195712   ;;  %vm25_vm3 = vcmask 130112   ;;  %s55_s0 = inlined_call_operand.vmem [shape: f32[4,8], index: 0, kind: input, shape index: {}]   ;;  %s56_s1 = inlined_call_operand.vmem [shape: f32[1,32], index: 1, kind: output, shape index: {}]  }
   0x1   :  { %v4_v0 = vld [vmem:[%s55_s0] sm:$0xf]  ;;  %s36_s0 = smov 24  }
   0x2   :  { %5 = vst [vmem:[#allocation1] sm:$0xf] %v4_v0 }
   0x9   :  { %v10_v1 = vld [vmem:[#allocation1 + $0x3] sm:$0x1]   ;;  %v22_v2 = vld [vmem:[#allocation1 + $0x1] sm:$0x1]   ;;  %v6_v3 = vld [vmem:[#allocation1] sm:$0x1]  }
   0xa   :  { %11 = vrot.lane.b32.xlu0 %v10_v1, %s36_s0  ;;  %23 = vrot.lane.b32.xlu1 %v22_v2, %s37_s8  ;;  %v16_v4 = vld [vmem:[#allocation1 + $0x2] sm:$0x1]   ;;  %8 = vst.msk [vmem:[#allocation0] sm:$0x1] %vm7_vm0, %v6_v3  }
   0xe   :  { %17 = vrot.lane.b32.xlu0 %v16_v4, %s38_s9 }
  0x7c   :  { %v12_v5 = vpop.permute.xlu0 %11   ;;  %v24_v6 = vpop.permute.xlu1 %23  }
  0x7d   :  { %14 = vst.msk [vmem:[#allocation0] sm:$0x1] %vm13_vm1, %v12_v5  }
  0x80   :  { %v18_v7 = vpop.permute.xlu0 %17  }
  0x81   :  { %20 = vst.msk [vmem:[#allocation0] sm:$0x1] %vm19_vm2, %v18_v7  }
  0x82   :  { %26 = vst.msk [vmem:[#allocation0] sm:$0x1] %vm25_vm3, %v24_v6  }
  0x89   :  { %v30_v8 = vld [vmem:[#allocation0] sm:$0x1] }
  0x8a   :  { %32 = vst [vmem:[%s56_s1] sm:$0x1] %v30_v8 }

// kernel: resblock_cond_forward.1
= control target key start
LH: loop header
LB: loop body
LE: loop exit
PB: predicated region body
PF: predicated region fallthrough
CT: control target
= control target key end

     0   :  { %s3411_s24 = smov 0   ;;  %s4145_s0 = inlined_call_operand.vmem [shape: f32[2,100,32], index: 0, kind: input, shape index: {}]   ;;  %s4146_s1 = inlined_call_operand.vmem [shape: bf16[4,32,32], index: 1, kind: input, shape index: {}]   ;;  %s4147_s2 = inlined_call_operand.vmem [shape: bf16[9,32,16], index: 2, kind: input, shape index: {}]   ;;  %s4148_s3 = inlined_call_operand.vmem [shape: bf16[4,32,16], index: 3, kind: input, shape index: {}]   ;;  %s4149_s4 = inlined_call_operand.vmem [shape: f32[1,32], index: 4, kind: input, shape index: {}]   ;;  %s4150_s5 = inlined_call_operand.vmem [shape: f32[1,16], index: 5, kind: input, shape index: {}]   ;;  %s4151_s6 = inlined_call_operand.vmem [shape: f32[80,1], index: 6, kind: input, shape index: {}]   ;;  %s4152_s7 = inlined_call_operand.vmem [shape: f32[2,80,16], index: 7, kind: output, shape index: {}]  }
   0x1 LB: > { %s2594_s25 = sadd.s32 4294967295, %s3366_s24   ;;  %p2598_p0 = scmp.ge.s32.totalorder %s3366_s24, 1  ;;  %s3366_s24 = sphi %s3411_s24, %s17_s24  }
   0x2   : > { %p237_p1 = scmp.lt.s32.totalorder %s3366_s24, 3 }
   0x4   : > { %p238_p2 = pnand %p2598_p0, %p237_p1 }
   0x5   : > { %v3326_v0 = vld [vmem:[%s4146_s1 + $0x10] sm:$0xff] (!%p238_p2)   ;;  %v3368_v1 = vmov (!%p238_p2), 0.0   ;;  %v3327_v2 = vld [vmem:[%s4146_s1 + $0x18] sm:$0xff] (!%p238_p2)   ;;  %p269_p3 = scmp.lt.s32.totalorder (!%p238_p2), %s2594_s25, 1  ;;  %vm335_vm0 = vcmask (!%p238_p2), 261120   ;;  %vm3369_vm1 = vmmov (!%p238_p2), 0  }
   0x6   : > { %241 = sbr.rel (%p238_p2) target bundleno = 777 (0x309), region = 48  ;;  %2899 = vmatprep.subr.bf16.mxu0 (!%p238_p2), %v3368_v1  ;;  %3307 = vmatprep.subr.bf16.mxu1 (!%p238_p2), %v3368_v1  ;;  %1286 = vst.msk [vmem:[#allocation2] sm:$0xff] (!%p238_p2), %vm335_vm0, %v3368_v1  ;;  %1299 = vst.msk [vmem:[#allocation2 + $0x5b] sm:$0xff] (!%p238_p2), %vm335_vm0, %v3368_v1  ;;  %v3328_v3 = vld [vmem:[%s4148_s3 + $0x10] sm:$0xff] (!%p238_p2)   ;;  %v3329_v10 = vld [vmem:[%s4146_s1] sm:$0xff] (!%p238_p2)   ;;  %v3370_v42 = vmov (!%p238_p2), 0  }
   0x7   : > { %2900 = vmatpush3.bf16.msra.mxu0 (!%p238_p2), %v3326_v0  ;;  %3309 = vmatpush3.bf16.msra.mxu1 (!%p238_p2), %v3326_v0  ;;  %1300 = vst.msk [vmem:[#allocation2 + $0x63] sm:$0xff] (!%p238_p2), %vm335_vm0, %v3368_v1  ;;  %v3331_v13 = vld [vmem:[%s4148_s3 + $0x18] sm:$0xff] (!%p238_p2)   ;;  %v3330_v16 = vld [vmem:[%s4146_s1 + $0x8] sm:$0xff] (!%p238_p2)   ;;  %v3334_v25 = vld [vmem:[%s4148_s3] sm:$0xff] (!%p238_p2)   ;;  %vm1287_vm2 = vcmask (!%p238_p2), 256000   ;;  %vm2528_vm15 = vcmask (!%p238_p2), 130048  }
   0x8   : > { %2901 = vmatprep.subr.bf16.mxu0 (!%p238_p2), %v3368_v1  ;;  %3308 = vmatprep.subr.bf16.mxu1 (!%p238_p2), %v3368_v1  ;;  %v3335_v28 = vld [vmem:[%s4148_s3 + $0x8] sm:$0xff] (!%p238_p2)   ;;  %v3332_v29 = vld [vmem:[%s4146_s1 + $0x20] sm:$0xff] (!%p238_p2)   ;;  %v1218_v39 = vld [vmem:[%s4151_s6 + $0x10] sm:$0xff] (!%p238_p2)  ;;  %1288 = vst.msk [vmem:[#allocation2 + $0x8] sm:$0x7] (!%p238_p2), %vm1287_vm2, %v3368_v1 }
   0x9   : > { %2903 = vmatprep.mubr.msk.bf16.mxu0 (!%p238_p2), %vm3369_vm1, %v3368_v1  ;;  %2915 = vmatprep.mubr.msk.bf16.mxu1 (!%p238_p2), %vm3369_vm1, %v3368_v1  ;;  %v3333_v31 = vld [vmem:[%s4146_s1 + $0x28] sm:$0xff] (!%p238_p2)   ;;  %v1216_v38 = vld [vmem:[%s4151_s6] sm:$0xff] (!%p238_p2)  ;;  %v1219_v45 = vld [vmem:[%s4151_s6 + $0x18] sm:$0xff] (!%p238_p2) }
   0xa   : > { %3324 = vset.pattern.permute.xlu0 (!%p238_p2), %v3370_v42  ;;  %3325 = vset.pattern.permute.xlu1 (!%p238_p2), %v3370_v42  ;;  %v1217_v43 = vld [vmem:[%s4151_s6 + $0x8] sm:$0xff] (!%p238_p2)  ;;  %v1220_v46 = vld [vmem:[%s4151_s6 + $0x20] sm:$0xff] (!%p238_p2)  ;;  %v1222_v48 = vld [vmem:[%s4151_s6 + $0x30] sm:$0xff] (!%p238_p2) }
   0xb   : > { %2902 = vmatpush3.bf16.msra.mxu0 (!%p238_p2), %v3327_v2  ;;  %3310 = vmatpush3.bf16.msra.mxu1 (!%p238_p2), %v3327_v2  ;;  %v1221_v47 = vld [vmem:[%s4151_s6 + $0x28] sm:$0xff] (!%p238_p2)  ;;  %v1223_v49 = vld [vmem:[%s4151_s6 + $0x38] sm:$0xff] (!%p238_p2)  ;;  %v3338_v50 = vld [vmem:[%s4148_s3 + $0x20] sm:$0xff] (!%p238_p2)  }
   0xc   : > { %2947 = vmatprep.subr.bf16.mxu0 (!%p238_p2), %v3368_v1  ;;  %2923 = vmatprep.subr.bf16.mxu1 (!%p238_p2), %v3368_v1  ;;  %v1224_v51 = vld [vmem:[%s4151_s6 + $0x40] sm:$0xff] (!%p238_p2)  ;;  %v1225_v54 = vld [vmem:[%s4151_s6 + $0x48] sm:$0xff] (!%p238_p2)  ;;  %v3336_v57 = vld [vmem:[%s4146_s1 + $0x30] sm:$0xff] (!%p238_p2)  }
   0xd   : > { %s4154_s25 = smov (!%p269_p3, %s2594_s25), 1  ;;  %1228 = vperm.xlu0 %3324, %v1216_v38   ;;  %1238 = vperm.xlu1 %3325, %v1218_v39   ;;  %v3339_v55 = vld [vmem:[%s4148_s3 + $0x28] sm:$0xff]   ;;  %v3337_v60 = vld [vmem:[%s4146_s1 + $0x38] sm:$0xff]  }
   0xe   : > { %s3311_s30 = smul.u32 104, %s4154_s25 }
   0xf   : > { %s3312_s17 = smul.u32 80, %s4154_s25 }
  0x10   : > { %s3447_s10 = scalar_lea.vmem %s4145_s0, %s3311_s30 }
  0x11   : > { %v303_v4 = vld [vmem:[%s3447_s10 + $0x1] sm:$0xff]  ;;  %v304_v5 = vld [vmem:[%s3447_s10 + $0x9] sm:$0xff]  ;;  %v309_v6 = vld [vmem:[%s3447_s10 + $0x31] sm:$0xff]  ;;  %1233 = vperm.xlu0 %3324, %v1217_v43   ;;  %1243 = vperm.xlu1 %3325, %v1219_v45   ;;  %s4096_s19 = scalar_lea.vmem %s4152_s7, %s3312_s17 }
  0x12   : > { %v313_v7 = vpack.c.bf16 %v304_v5, %v303_v4  ;;  %v310_v8 = vld [vmem:[%s3447_s10 + $0x39] sm:$0xff]  ;;  %v305_v11 = vld [vmem:[%s3447_s10 + $0x11] sm:$0xff]  ;;  %v311_v14 = vld [vmem:[%s3447_s10 + $0x41] sm:$0xff] }
  0x13   : > { %v3456_v9 = vpack.c.bf16 %v310_v8, %v309_v6  ;;  %v306_v12 = vld [vmem:[%s3447_s10 + $0x19] sm:$0xff]  ;;  %v312_v15 = vld [vmem:[%s3447_s10 + $0x49] sm:$0xff]  ;;  %v307_v19 = vld [vmem:[%s3447_s10 + $0x21] sm:$0xff] }
  0x14   : > { %2904 = vmatmul.mubr.msk.bf16.vlgmr.msra.gmra.mrb[0].mxu0 %vm335_vm0, %v313_v7  ;;  %v314_v17 = vpack.c.bf16 %v306_v12, %v305_v11  ;;  %v3480_v18 = vpack.c.bf16 %v312_v15, %v311_v14  ;;  %v308_v20 = vld [vmem:[%s3447_s10 + $0x29] sm:$0xff]  ;;  %v280_v21 = vld [vmem:[%s3447_s10] sm:$0xff]  ;;  %v283_v27 = vld [vmem:[%s3447_s10 + $0x18] sm:$0xff] }
  0x15   : > { %2916 = vmatmul.mubr.msk.bf16.vlgmr.msra.gmra.mrb[0].mxu1 %vm335_vm0, %v3456_v9  ;;  %2948 = vmatpush3.bf16.msra.mxu0 %v3328_v3  ;;  %v281_v22 = vld [vmem:[%s3447_s10 + $0x8] sm:$0xff]  ;;  %v315_v23 = vpack.c.bf16 %v308_v20, %v307_v19  ;;  %v282_v26 = vld [vmem:[%s3447_s10 + $0x10] sm:$0xff]  ;;  %v284_v32 = vld [vmem:[%s3447_s10 + $0x20] sm:$0xff] }
  0x16   : > { %2907 = vmatprep.mubr.msk.bf16.mxu0 %vm3369_vm1, %v3368_v1  ;;  %2919 = vmatprep.mubr.msk.bf16.mxu1 %vm3369_vm1, %v3368_v1  ;;  %v3495_v24 = vpack.c.bf16 %v281_v22, %v280_v21  ;;  %v3516_v30 = vpack.c.bf16 %v283_v27, %v282_v26  ;;  %v285_v33 = vld [vmem:[%s3447_s10 + $0x28] sm:$0xff]  ;;  %v286_v35 = vld [vmem:[%s3447_s10 + $0x30] sm:$0xff]  ;;  %v287_v36 = vld [vmem:[%s3447_s10 + $0x38] sm:$0xff] }
  0x17   : > { %2924 = vmatpush3.bf16.msra.mxu1 %v3329_v10  ;;  %2949 = vmatprep.subr.bf16.mxu0 %v3368_v1  ;;  %v3532_v34 = vpack.c.bf16 %v285_v33, %v284_v32  ;;  %v3544_v37 = vpack.c.bf16 %v287_v36, %v286_v35  ;;  %v288_v40 = vld [vmem:[%s3447_s10 + $0x40] sm:$0xff]  ;;  %v289_v41 = vld [vmem:[%s3447_s10 + $0x48] sm:$0xff]  ;;  %v700_v53 = vld [vmem:[%s3447_s10 + $0x12] sm:$0xff] }
  0x18   : > { %2925 = vmatprep.subr.bf16.mxu1 %v3368_v1  ;;  %v294_v44 = vpack.c.bf16 %v289_v41, %v288_v40  ;;  %1248 = vperm.xlu0 %3324, %v1220_v46   ;;  %v699_v52 = vld [vmem:[%s3447_s10 + $0xa] sm:$0xff]  ;;  %v701_v58 = vld [vmem:[%s3447_s10 + $0x1a] sm:$0xff]  ;;  %v702_v59 = vld [vmem:[%s3447_s10 + $0x22] sm:$0xff] }
  0x19   : > { %2950 = vmatpush3.bf16.msra.mxu0 %v3331_v13  ;;  %1253 = vperm.xlu1 %3325, %v1221_v47   ;;  %v709_v56 = vpack.c.bf16 %v700_v53, %v699_v52  ;;  %v710_v61 = vpack.c.bf16 %v702_v59, %v701_v58  ;;  %v703_v62 = vld [vmem:[%s3447_s10 + $0x2a] sm:$0xff]  ;;  %v704_v63 = vld [vmem:[%s3447_s10 + $0x32] sm:$0xff]  ;;  %v705_v2 = vld [vmem:[%s3447_s10 + $0x3a] sm:$0xff] }
  0x1a   : > { %2995 = vmatprep.subr.bf16.mxu0 %v3368_v1  ;;  %v711_v0 = vpack.c.bf16 %v704_v63, %v703_v62  ;;  %v706_v3 = vld [vmem:[%s3447_s10 + $0x42] sm:$0xff]  ;;  %v707_v5 = vld [vmem:[%s3447_s10 + $0x4a] sm:$0xff]  ;;  %v708_v6 = vld [vmem:[%s3447_s10 + $0x52] sm:$0xff] }
  0x1b   : > { %2926 = vmatpush3.bf16.msra.mxu1 %v3330_v16  ;;  %v712_v4 = vpack.c.bf16 %v706_v3, %v705_v2  ;;  %v3340_v8 = vld [vmem:[%s4148_s3 + $0x30] sm:$0xff]   ;;  %v3341_v11 = vld [vmem:[%s4148_s3 + $0x38] sm:$0xff]   ;;  %v932_v14 = vld [vmem:[%s3447_s10 + $0x23] sm:$0xff] }
  0x1c   : > { %2908 = vmatmul.mubr.msk.bf16.gmra.mrb[4].mxu0 %vm335_vm0, %v314_v17  ;;  %2971 = vmatprep.subr.bf16.mxu1 %v3368_v1  ;;  %v930_v10 = vld [vmem:[%s3447_s10 + $0x13] sm:$0xff]  ;;  %v931_v13 = vld [vmem:[%s3447_s10 + $0x1b] sm:$0xff]  ;;  %v933_v16 = vld [vmem:[%s3447_s10 + $0x2b] sm:$0xff] }
  0x1d   : > { %2920 = vmatmul.mubr.msk.bf16.gmra.mrb[4].mxu1 %vm335_vm0, %v3480_v18  ;;  %2911 = vmatprep.mubr.msk.bf16.mxu0 %vm3369_vm1, %v3368_v1  ;;  %v940_v15 = vpack.c.bf16 %v932_v14, %v931_v13  ;;  %v935_v19 = vld [vmem:[%s3447_s10 + $0x3b] sm:$0xff]  ;;  %v936_v20 = vld [vmem:[%s3447_s10 + $0x43] sm:$0xff]  ;;  %v937_v22 = vld [vmem:[%s3447_s10 + $0x4b] sm:$0xff] }
  0x1e   : > { %2927 = vmatprep.mubr.msk.bf16.mxu1 %vm3369_vm1, %v3368_v1  ;;  %1258 = vperm.xlu0 %3324, %v1222_v48   ;;  %v942_v21 = vpack.c.bf16 %v936_v20, %v935_v19  ;;  %v3343_v26 = vld [vmem:[%s4147_s2 + $0x18] sm:$0xff]   ;;  %v3344_v27 = vld [vmem:[%s4147_s2] sm:$0xff]  }
  0x1f   : > { %1263 = vperm.xlu1 %3325, %v1223_v49  }
  0x22   : > { %1268 = vperm.xlu0 %3324, %v1224_v51  }
  0x23   : > { %1273 = vperm.xlu1 %3325, %v1225_v54  }
  0x24   : > { %2912 = vmatmul.mubr.msk.bf16.gmra.mrb[8].mxu0 %vm335_vm0, %v315_v23 }
  0x25   : > { %2928 = vmatmul.mubr.msk.bf16.vlgmr.msra.gmra.mrb[8].mxu1 %vm335_vm0, %v3495_v24  ;;  %2951 = vmatprep.mubr.msk.bf16.mxu0 %vm3369_vm1, %v3368_v1 }
  0x26   : > { %2931 = vmatprep.mubr.msk.bf16.mxu1 %vm3369_vm1, %v3368_v1  ;;  %2972 = vmatpush3.bf16.msra.mxu1 %v3334_v25  ;;  %v3342_v25 = vld [vmem:[%s4147_s2 + $0x10] sm:$0xff]  }
  0x27   : > { %2973 = vmatprep.subr.bf16.mxu1 %v3368_v1 }
  0x2a   : > { %2974 = vmatpush3.bf16.msra.mxu1 %v3335_v28  ;;  %v3345_v28 = vld [vmem:[%s4147_s2 + $0x8] sm:$0xff]  }
  0x2b   : > { %3019 = vmatprep.subr.bf16.mxu1 %v3368_v1 }
  0x2c   : > { %2952 = vmatmul.mubr.msk.bf16.vlgmr.msra.gmra.mrb[12].mxu0 %vm335_vm0, %v313_v7  ;;  %v713_v7 = vpack.c.bf16 %v708_v6, %v707_v5 }
  0x2d   : > { %2932 = vmatmul.mubr.msk.bf16.gmra.mrb[12].mxu1 %vm335_vm0, %v3516_v30  ;;  %2996 = vmatpush3.bf16.msra.mxu0 %v3332_v29 }
  0x2e   : > { %2935 = vmatprep.mubr.msk.bf16.mxu1 %vm3369_vm1, %v3368_v1  ;;  %2955 = vmatprep.mubr.msk.bf16.mxu0 %vm3369_vm1, %v3368_v1 }
  0x2f   : > { %2997 = vmatprep.subr.bf16.mxu0 %v3368_v1 }
  0x31   : > { %2998 = vmatpush3.bf16.msra.mxu0 %v3333_v31 }
  0x32   : > { %3043 = vmatprep.subr.bf16.mxu0 %v3368_v1 }
  0x34   : > { %2956 = vmatmul.mubr.msk.bf16.gmra.mrb[16].mxu0 %vm335_vm0, %v314_v17  ;;  %v934_v17 = vld [vmem:[%s3447_s10 + $0x33] sm:$0xff] }
  0x35   : > { %2936 = vmatmul.mubr.msk.bf16.gmra.mrb[16].mxu1 %vm335_vm0, %v3532_v34  ;;  %2959 = vmatprep.mubr.msk.bf16.mxu0 %vm3369_vm1, %v3368_v1 }
  0x36   : > { %2939 = vmatprep.mubr.msk.bf16.mxu1 %vm3369_vm1, %v3368_v1 }
  0x3c   : > { %2960 = vmatmul.mubr.msk.bf16.gmra.mrb[20].mxu0 %vm335_vm0, %v315_v23  ;;  %v938_v23 = vld [vmem:[%s3447_s10 + $0x53] sm:$0xff] }
  0x3d   : > { %2940 = vmatmul.mubr.msk.bf16.gmra.mrb[20].mxu1 %vm335_vm0, %v3544_v37  ;;  %2963 = vmatprep.mubr.msk.bf16.mxu0 %vm3369_vm1, %v3368_v1 }
  0x3e   : > { %2943 = vmatprep.mubr.msk.bf16.mxu1 %vm3369_vm1, %v3368_v1 }
  0x44   : > { %2964 = vmatmul.mubr.msk.bf16.gmra.mrb[24].mxu0 %vm335_vm0, %v3456_v9  ;;  %v929_v9 = vld [vmem:[%s3447_s10 + $0xb] sm:$0xff] }
  0x45   : > { %2944 = vmatmul.mubr.msk.bf16.gmra.mrb[24].mxu1 %vm335_vm0, %v294_v44  ;;  %2967 = vmatprep.mubr.msk.bf16.mxu0 %vm3369_vm1, %v3368_v1  ;;  %v939_v12 = vpack.c.bf16 %v930_v10, %v929_v9 }
  0x46   : > { %2975 = vmatprep.mubr.msk.bf16.mxu1 %vm3369_vm1, %v3368_v1 }
  0x4c   : > { %2968 = vmatmul.mubr.msk.bf16.gmra.mrb[28].mxu0 %vm335_vm0, %v3480_v18  ;;  %v941_v18 = vpack.c.bf16 %v934_v17, %v933_v16 }
  0x4d   : > { %2976 = vmatmul.mubr.msk.bf16.vlgmr.msra.gmra.mrb[28].mxu1 %vm335_vm0, %v3495_v24  ;;  %2999 = vmatprep.mubr.msk.bf16.mxu0 %vm3369_vm1, %v3368_v1  ;;  %v943_v24 = vpack.c.bf16 %v938_v23, %v937_v22 }
  0x4e   : > { %2979 = vmatprep.mubr.msk.bf16.mxu1 %vm3369_vm1, %v3368_v1  ;;  %3020 = vmatpush3.bf16.msra.mxu1 %v3338_v50 }
  0x4f   : > { %3021 = vmatprep.subr.bf16.mxu1 %v3368_v1 }
  0x52   : > { %3022 = vmatpush3.bf16.msra.mxu1 %v3339_v55 }
  0x53   : > { %3067 = vmatprep.subr.bf16.mxu1 %v3368_v1 }
  0x54   : > { %3000 = vmatmul.mubr.msk.bf16.vlgmr.msra.gmra.mrb[32].mxu0 %vm335_vm0, %v709_v56 }
  0x55   : > { %2980 = vmatmul.mubr.msk.bf16.gmra.mrb[32].mxu1 %vm335_vm0, %v3516_v30  ;;  %3044 = vmatpush3.bf16.msra.mxu0 %v3336_v57 }
  0x56   : > { %2983 = vmatprep.mubr.msk.bf16.mxu1 %vm3369_vm1, %v3368_v1  ;;  %3003 = vmatprep.mubr.msk.bf16.mxu0 %vm3369_vm1, %v3368_v1 }
  0x57   : > { %3045 = vmatprep.subr.bf16.mxu0 %v3368_v1 }
  0x59   : > { %3046 = vmatpush3.bf16.msra.mxu0 %v3337_v60 }
  0x5a   : > { %3091 = vmatprep.subr.bf16.mxu0 %v3368_v1 }
  0x5c   : > { %3004 = vmatmul.mubr.msk.bf16.gmra.mrb[36].mxu0 %vm335_vm0, %v710_v61 }
  0x5d   : > { %2984 = vmatmul.mubr.msk.bf16.gmra.mrb[36].mxu1 %vm335_vm0, %v3532_v34  ;;  %3007 = vmatprep.mubr.msk.bf16.mxu0 %vm3369_vm1, %v3368_v1 }
  0x5e   : > { %2987 = vmatprep.mubr.msk.bf16.mxu1 %vm3369_vm1, %v3368_v1 }
  0x64   : > { %3008 = vmatmul.mubr.msk.bf16.gmra.mrb[40].mxu0 %vm335_vm0, %v711_v0 }
  0x65   : > { %2988 = vmatmul.mubr.msk.bf16.gmra.mrb[40].mxu1 %vm335_vm0, %v3544_v37  ;;  %3011 = vmatprep.mubr.msk.bf16.mxu0 %vm3369_vm1, %v3368_v1 }
  0x66   : > { %2991 = vmatprep.mubr.msk.bf16.mxu1 %vm3369_vm1, %v3368_v1 }
  0x6c   : > { %3012 = vmatmul.mubr.msk.bf16.gmra.mrb[44].mxu0 %vm335_vm0, %v712_v4 }
  0x6d   : > { %2992 = vmatmul.mubr.msk.bf16.gmra.mrb[44].mxu1 %vm335_vm0, %v294_v44  ;;  %3015 = vmatprep.mubr.msk.bf16.mxu0 %vm3369_vm1, %v3368_v1 }
  0x6e   : > { %3023 = vmatprep.mubr.msk.bf16.mxu1 %vm3369_vm1, %v3368_v1 }
  0x74   : > { %3016 = vmatmul.mubr.msk.bf16.gmra.mrb[48].mxu0 %vm335_vm0, %v713_v7 }
  0x75   : > { %3024 = vmatmul.mubr.msk.bf16.vlgmr.msra.gmra.mrb[48].mxu1 %vm335_vm0, %v709_v56  ;;  %3047 = vmatprep.mubr.msk.bf16.mxu0 %vm3369_vm1, %v3368_v1 }
  0x76   : > { %3027 = vmatprep.mubr.msk.bf16.mxu1 %vm3369_vm1, %v3368_v1  ;;  %3068 = vmatpush3.bf16.msra.mxu1 %v3340_v8 }
  0x77   : > { %3069 = vmatprep.subr.bf16.mxu1 %v3368_v1 }
  0x7a   : > { %3070 = vmatpush3.bf16.msra.mxu1 %v3341_v11 }
  0x7b   : > { %3115 = vmatprep.subr.bf16.mxu1 %v3368_v1 }
  0x7c   : > { %3048 = vmatmul.mubr.msk.bf16.vlgmr.msra.gmra.mrb[52].mxu0 %vm335_vm0, %v939_v12 }
  0x7d   : > { %3028 = vmatmul.mubr.msk.bf16.gmra.mrb[52].mxu1 %vm335_vm0, %v710_v61  ;;  %3051 = vmatprep.mubr.msk.bf16.mxu0 %vm3369_vm1, %v3368_v1 }
  0x7e   : > { %3031 = vmatprep.mubr.msk.bf16.mxu1 %vm3369_vm1, %v3368_v1  ;;  %3092 = vmatpush3.bf16.msra.mxu0 %v3342_v25 }
  0x7f   : > { %3093 = vmatprep.subr.bf16.mxu0 %v3368_v1 }
  0x82   : > { %3094 = vmatpush3.bf16.msra.mxu0 %v3343_v26 }
  0x83   : > { %3139 = vmatprep.subr.bf16.mxu0 %v3368_v1 }
  0x84   : > { %3052 = vmatmul.mubr.msk.bf16.gmra.mrb[56].mxu0 %vm335_vm0, %v940_v15 }
  0x85   : > { %3032 = vmatmul.mubr.msk.bf16.gmra.mrb[56].mxu1 %vm335_vm0, %v711_v0  ;;  %3055 = vmatprep.mubr.msk.bf16.mxu0 %vm3369_vm1, %v3368_v1 }
  0x86   : > { %3035 = vmatprep.mubr.msk.bf16.mxu1 %vm3369_vm1, %v3368_v1 }
  0x8c   : > { %3056 = vmatmul.mubr.msk.bf16.gmra.mrb[60].mxu0 %vm335_vm0, %v941_v18 }
  0x8d   : > { %3036 = vmatmul.mubr.msk.bf16.gmra.mrb[60].mxu1 %vm335_vm0, %v712_v4  ;;  %3059 = vmatprep.mubr.msk.bf16.mxu0 %vm3369_vm1, %v3368_v1 }
  0x8e   : > { %3039 = vmatprep.mubr.msk.bf16.mxu1 %vm3369_vm1, %v3368_v1 }
  0x94   : > { %3060 = vmatmul.mubr.msk.bf16.gmra.mrb[64].mxu0 %vm335_vm0, %v942_v21 }
  0x95   : > { %3040 = vmatmul.mubr.msk.bf16.gmra.mrb[64].mxu1 %vm335_vm0, %v713_v7  ;;  %3063 = vmatprep.mubr.msk.bf16.mxu0 %vm3369_vm1, %v3368_v1 }
  0x96   : > { %3071 = vmatprep.mubr.msk.bf16.mxu1 %vm3369_vm1, %v3368_v1 }
  0x9c   : > { %3064 = vmatmul.mubr.msk.bf16.gmra.mrb[68].mxu0 %vm335_vm0, %v943_v24 }
  0x9d   : > { %3072 = vmatmul.mubr.msk.bf16.vlgmr.msra.gmra.mrb[68].mxu1 %vm335_vm0, %v939_v12  ;;  %3095 = vmatprep.mubr.msk.bf16.mxu0 %vm3369_vm1, %v3368_v1 }
  0x9e   : > { %3075 = vmatprep.mubr.msk.bf16.mxu1 %vm3369_vm1, %v3368_v1  ;;  %3116 = vmatpush3.bf16.msra.mxu1 %v3344_v27 }
  0x9f   : > { %3117 = vmatprep.subr.bf16.mxu1 %v3368_v1 }
  0xa2   : > { %3118 = vmatpush3.bf16.msra.mxu1 %v3345_v28 }
  0xa3   : > { %3163 = vmatprep.subr.bf16.mxu1 %v3368_v1 }
  0xa5   : > { %3076 = vmatmul.mubr.msk.bf16.gmra.mrb[72].mxu1 %vm335_vm0, %v940_v15 }
  0xa6   : > { %3079 = vmatprep.mubr.msk.bf16.mxu1 %vm3369_vm1, %v3368_v1 }
  0xad   : > { %3080 = vmatmul.mubr.msk.bf16.gmra.mrb[76].mxu1 %vm335_vm0, %v941_v18 }
  0xae   : > { %3083 = vmatprep.mubr.msk.bf16.mxu1 %vm3369_vm1, %v3368_v1 }
  0xb5   : > { %3084 = vmatmul.mubr.msk.bf16.gmra.mrb[80].mxu1 %vm335_vm0, %v942_v21 }
  0xb6   : > { %3087 = vmatprep.mubr.msk.bf16.mxu1 %vm3369_vm1, %v3368_v1 }
  0xbd   : > { %3088 = vmatmul.mubr.msk.bf16.gmra.mrb[84].mxu1 %vm335_vm0, %v943_v24 }
  0xbe   : > { %3119 = vmatprep.mubr.msk.bf16.mxu1 %vm3369_vm1, %v3368_v1 }
  0xe7   : > { %v385_v29 = vpop.f32.mrb[0].mxu0 }
  0xe8   : > { %v2905_v30 = vpop.f32.mrb[1].mxu0  ;;  %v409_v31 = vpop.f32.mrb[0].mxu1 }
  0xe9   : > { %v388_v32 = vpop.f32.mrb[2].mxu0  ;;  %v2917_v33 = vpop.f32.mrb[1].mxu1 }
  0xea   : > { %v2906_v34 = vpop.f32.mrb[3].mxu0  ;;  %v412_v35 = vpop.f32.mrb[2].mxu1 }
  0xeb   : > { %v2918_v36 = vpop.f32.mrb[3].mxu1 }
  0xef   : > { %v393_v37 = vpop.f32.mrb[4].mxu0 }
  0xf0   : > { %v2909_v38 = vpop.f32.mrb[5].mxu0  ;;  %v417_v39 = vpop.f32.mrb[4].mxu1 }
  0xf1   : > { %v396_v40 = vpop.f32.mrb[6].mxu0  ;;  %v2921_v41 = vpop.f32.mrb[5].mxu1 }
  0xf2   : > { %v2910_v42 = vpop.f32.mrb[7].mxu0  ;;  %v420_v43 = vpop.f32.mrb[6].mxu1 }
  0xf3   : > { %v2922_v44 = vpop.f32.mrb[7].mxu1 }
  0xf7   : > { %v401_v45 = vpop.f32.mrb[8].mxu0 }
  0xf8   : > { %v485_v46 = vpop.f32.mrb[8].mxu1  ;;  %v2913_v47 = vpop.f32.mrb[9].mxu0 }
  0xf9   : > { %v486_v48 = vadd.f32 %v485_v46, %v385_v29  ;;  %v2929_v49 = vpop.f32.mrb[9].mxu1  ;;  %v404_v50 = vpop.f32.mrb[10].mxu0 }
  0xfa   : > { %v488_v51 = vpop.f32.mrb[10].mxu1  ;;  %v2914_v52 = vpop.f32.mrb[11].mxu0 }
  0xfb   : > { %v489_v53 = vadd.f32 %v488_v51, %v388_v32  ;;  %v2930_v54 = vpop.f32.mrb[11].mxu1 }
  0xff   : > { %v575_v55 = vpop.f32.mrb[12].mxu0 }
 0x100   : > { %v493_v56 = vpop.f32.mrb[12].mxu1  ;;  %v2953_v57 = vpop.f32.mrb[13].mxu0 }
 0x101   : > { %v494_v58 = vadd.f32 %v493_v56, %v393_v37  ;;  %v2933_v59 = vpop.f32.mrb[13].mxu1  ;;  %v578_v60 = vpop.f32.mrb[14].mxu0 }
 0x102   : > { %v496_v61 = vpop.f32.mrb[14].mxu1  ;;  %v2954_v62 = vpop.f32.mrb[15].mxu0 }
 0x103   : > { %v497_v63 = vadd.f32 %v496_v61, %v396_v40  ;;  %v2934_v0 = vpop.f32.mrb[15].mxu1 }
 0x107   : > { %v583_v2 = vpop.f32.mrb[16].mxu0 }
 0x108   : > { %v501_v3 = vpop.f32.mrb[16].mxu1  ;;  %v2957_v4 = vpop.f32.mrb[17].mxu0 }
 0x109   : > { %v3736_v5 = vadd.f32 %v501_v3, %v401_v45  ;;  %v2937_v6 = vpop.f32.mrb[17].mxu1  ;;  %v586_v7 = vpop.f32.mrb[18].mxu0 }
 0x10a   : > { %v504_v8 = vpop.f32.mrb[18].mxu1  ;;  %v2958_v9 = vpop.f32.mrb[19].mxu0 }
 0x10b   : > { %v3738_v10 = vadd.f32 %v504_v8, %v404_v50  ;;  %v2938_v11 = vpop.f32.mrb[19].mxu1 }
 0x10f   : > { %v591_v12 = vpop.f32.mrb[20].mxu0 }
 0x110   : > { %v2961_v13 = vpop.f32.mrb[21].mxu0  ;;  %v509_v14 = vpop.f32.mrb[20].mxu1 }
 0x111   : > { %v594_v15 = vpop.f32.mrb[22].mxu0  ;;  %v3740_v16 = vadd.f32 %v509_v14, %v409_v31  ;;  %v2941_v17 = vpop.f32.mrb[21].mxu1 }
 0x112   : > { %v2962_v18 = vpop.f32.mrb[23].mxu0  ;;  %v512_v19 = vpop.f32.mrb[22].mxu1 }
 0x113   : > { %v3742_v20 = vadd.f32 %v512_v19, %v412_v35  ;;  %v2942_v21 = vpop.f32.mrb[23].mxu1 }
 0x117   : > { %v599_v22 = vpop.f32.mrb[24].mxu0 }
 0x118   : > { %v2965_v23 = vpop.f32.mrb[25].mxu0  ;;  %v517_v24 = vpop.f32.mrb[24].mxu1 }
 0x119   : > { %v602_v25 = vpop.f32.mrb[26].mxu0  ;;  %v3744_v26 = vadd.f32 %v517_v24, %v417_v39  ;;  %v2945_v27 = vpop.f32.mrb[25].mxu1 }
 0x11a   : > { %v2966_v28 = vpop.f32.mrb[27].mxu0  ;;  %v520_v29 = vpop.f32.mrb[26].mxu1 }
 0x11b   : > { %v3746_v30 = vadd.f32 %v520_v29, %v420_v43  ;;  %v2946_v32 = vpop.f32.mrb[27].mxu1 }
 0x11f   : > { %v607_v31 = vpop.f32.mrb[28].mxu0 }
 0x120   : > { %v660_v33 = vpop.f32.mrb[28].mxu1  ;;  %v2969_v34 = vpop.f32.mrb[29].mxu0 }
 0x121   : > { %v661_v36 = vadd.f32 %v660_v33, %v575_v55  ;;  %v2977_v37 = vpop.f32.mrb[29].mxu1  ;;  %v610_v35 = vpop.f32.mrb[30].mxu0 }
 0x122   : > { %v663_v38 = vpop.f32.mrb[30].mxu1  ;;  %v2970_v40 = vpop.f32.mrb[31].mxu0 }
 0x123   : > { %v664_v41 = vadd.f32 %v663_v38, %v578_v60  ;;  %v2978_v42 = vpop.f32.mrb[31].mxu1 }
 0x127   : > { %v780_v44 = vpop.f32.mrb[32].mxu0 }
 0x128   : > { %v668_v45 = vpop.f32.mrb[32].mxu1  ;;  %v819_v39 = vadd.f32 %v780_v44, %v486_v48  ;;  %v3001_v46 = vpop.f32.mrb[33].mxu0 }
 0x129   : > { %v669_v47 = vadd.f32 %v668_v45, %v583_v2  ;;  %v2981_v49 = vpop.f32.mrb[33].mxu1  ;;  %v783_v50 = vpop.f32.mrb[34].mxu0 }
 0x12a   : > { %v671_v43 = vpop.f32.mrb[34].mxu1  ;;  %v3748_v51 = vadd.f32 %v783_v50, %v489_v53  ;;  %v3002_v52 = vpop.f32.mrb[35].mxu0 }
 0x12b   : > { %v3750_v54 = vadd.f32 %v671_v43, %v586_v7  ;;  %v2982_v55 = vpop.f32.mrb[35].mxu1  ;;  %v1229_v45 = vpop.permute.xlu0 %1228 }
 0x12f   : > { %v788_v56 = vpop.f32.mrb[36].mxu0 }
 0x130   : > { %v676_v57 = vpop.f32.mrb[36].mxu1  ;;  %v3752_v59 = vadd.f32 %v788_v56, %v494_v58  ;;  %v3005_v60 = vpop.f32.mrb[37].mxu0 }
 0x131   : > { %v3754_v61 = vadd.f32 %v676_v57, %v591_v12  ;;  %v2985_v62 = vpop.f32.mrb[37].mxu1  ;;  %v791_v48 = vpop.f32.mrb[38].mxu0 }
 0x132   : > { %v679_v0 = vpop.f32.mrb[38].mxu1  ;;  %v3756_v2 = vadd.f32 %v791_v48, %v497_v63  ;;  %v3006_v3 = vpop.f32.mrb[39].mxu0 }
 0x133   : > { %v3758_v4 = vadd.f32 %v679_v0, %v594_v15  ;;  %v2986_v53 = vpop.f32.mrb[39].mxu1 }
 0x137   : > { %v796_v6 = vpop.f32.mrb[40].mxu0 }
 0x138   : > { %v684_v7 = vpop.f32.mrb[40].mxu1  ;;  %v3761_v8 = vadd.f32 %v796_v6, %v3736_v5  ;;  %v3009_v9 = vpop.f32.mrb[41].mxu0 }
 0x139   : > { %v3763_v58 = vadd.f32 %v684_v7, %v599_v22  ;;  %v2989_v11 = vpop.f32.mrb[41].mxu1  ;;  %v799_v12 = vpop.f32.mrb[42].mxu0 }
 0x13a   : > { %v687_v13 = vpop.f32.mrb[42].mxu1  ;;  %v3766_v14 = vadd.f32 %v799_v12, %v3738_v10  ;;  %v3010_v63 = vpop.f32.mrb[43].mxu0 }
 0x13b   : > { %v3768_v17 = vadd.f32 %v687_v13, %v602_v25  ;;  %v2990_v15 = vpop.f32.mrb[43].mxu1  ;;  %v1239_v6 = vpop.permute.xlu1 %1238 }
 0x13f   : > { %v804_v18 = vpop.f32.mrb[44].mxu0 }
 0x140   : > { %v692_v19 = vpop.f32.mrb[44].mxu1  ;;  %v3771_v21 = vadd.f32 %v804_v18, %v3740_v16  ;;  %v3013_v5 = vpop.f32.mrb[45].mxu0 }
 0x141   : > { %v3773_v23 = vadd.f32 %v692_v19, %v607_v31  ;;  %v2993_v22 = vpop.f32.mrb[45].mxu1  ;;  %v807_v24 = vpop.f32.mrb[46].mxu0 }
 0x142   : > { %v695_v27 = vpop.f32.mrb[46].mxu1  ;;  %v3776_v28 = vadd.f32 %v807_v24, %v3742_v20  ;;  %v3014_v10 = vpop.f32.mrb[47].mxu0 }
 0x143   : > { %v3778_v29 = vadd.f32 %v695_v27, %v610_v35  ;;  %v2994_v25 = vpop.f32.mrb[47].mxu1 }
 0x147   : > { %v812_v32 = vpop.f32.mrb[48].mxu0 }
 0x148   : > { %v3781_v33 = vadd.f32 %v812_v32, %v3744_v26  ;;  %v880_v34 = vpop.f32.mrb[48].mxu1  ;;  %v3017_v16 = vpop.f32.mrb[49].mxu0  ;;  %v3793_v26 = vld [vmem:[%s4149_s4] ss:$0 sm:$0xff] }
 0x149   : > { %v3783_v37 = vadd.f32 %v880_v34, %v661_v36  ;;  %v3025_v31 = vpop.f32.mrb[49].mxu1  ;;  %v815_v38 = vpop.f32.mrb[50].mxu0 }
 0x14a   : > { %v3786_v40 = vadd.f32 %v815_v38, %v3746_v30  ;;  %v883_v42 = vpop.f32.mrb[50].mxu1  ;;  %v3018_v20 = vpop.f32.mrb[51].mxu0 }
 0x14b   : > { %v3788_v44 = vadd.f32 %v883_v42, %v664_v41  ;;  %v3026_v35 = vpop.f32.mrb[51].mxu1  ;;  %v1244_v16 = vpop.permute.xlu1 %1243 }
 0x14f   : > { %v1010_v46 = vpop.f32.mrb[52].mxu0 }
 0x150   : > { %v888_v49 = vpop.f32.mrb[52].mxu1  ;;  %v1049_v36 = vadd.f32 %v1010_v46, %v819_v39  ;;  %v3049_v50 = vpop.f32.mrb[53].mxu0 }
 0x151   : > { %v3795_v43 = vadd.f32 %v888_v49, %v669_v47  ;;  %v3029_v52 = vpop.f32.mrb[53].mxu1  ;;  %v1013_v30 = vpop.f32.mrb[54].mxu0 }
 0x152   : > { %v1166_v55 = vadd.f32 %v3793_v26, %v1049_v36  ;;  %v891_v56 = vpop.f32.mrb[54].mxu1  ;;  %v1050_v41 = vadd.f32 %v1013_v30, %v3748_v51  ;;  %v3050_v57 = vpop.f32.mrb[55].mxu0 }
 0x153   : > { %v3800_v60 = vadd.f32 %v891_v56, %v3750_v54  ;;  %v3030_v62 = vpop.f32.mrb[55].mxu1  ;;  %v1234_v39 = vpop.permute.xlu0 %1233 }
 0x154   : > { %vm1176_vm3 = vcmp.ge.f32.partialorder %v1166_v55, 0.0  ;;  %v1186_v48 = vmul.f32 0.2, %v1166_v55  ;;  %v1167_v0 = vadd.f32 %v3793_v26, %v1050_v41 }
 0x156   : > { %v1196_v3 = vsel %vm1176_vm3, %v1166_v55, %v1186_v48  ;;  %vm1177_vm4 = vcmp.ge.f32.partialorder %v1167_v0, 0.0  ;;  %v1187_v47 = vmul.f32 0.2, %v1167_v0 }
 0x157   : > { %v1206_v53 = vmul.f32 1.4142135, %v1196_v3  ;;  %v1018_v7 = vpop.f32.mrb[56].mxu0 }
 0x158   : > { %v1197_v9 = vsel %vm1177_vm4, %v1167_v0, %v1187_v47  ;;  %v896_v11 = vpop.f32.mrb[56].mxu1  ;;  %v1051_v51 = vadd.f32 %v1018_v7, %v3752_v59  ;;  %v3053_v12 = vpop.f32.mrb[57].mxu0 }
 0x159   : > { %v1276_v13 = vmul.f32 %v1229_v45, %v1206_v53  ;;  %v1207_v54 = vmul.f32 1.4142135, %v1197_v9  ;;  %v3805_v63 = vadd.f32 %v896_v11, %v3754_v61  ;;  %v3033_v15 = vpop.f32.mrb[57].mxu1  ;;  %v1021_v18 = vpop.f32.mrb[58].mxu0  ;;  %v1302_v45 = vld [vmem:[#allocation2] sm:$0xff]  ;;  %v3348_v53 = vld [vmem:[%s4147_s2 + $0x30] sm:$0xff]  }
 0x15a   : > { %v1168_v19 = vadd.f32 %v3793_v26, %v1051_v51  ;;  %v899_v5 = vpop.f32.mrb[58].mxu1  ;;  %v1052_v22 = vadd.f32 %v1021_v18, %v3756_v2  ;;  %v3054_v24 = vpop.f32.mrb[59].mxu0  ;;  %v3347_v9 = vld [vmem:[%s4147_s2 + $0x28] sm:$0xff]  }
 0x15b   : > { %1289 = vst.msk [vmem:[#allocation2 + $0xb] sm:$0xff] %vm335_vm0, %v1276_v13  ;;  %v1277_v27 = vmul.f32 %v1234_v39, %v1207_v54  ;;  %v3811_v10 = vadd.f32 %v899_v5, %v3758_v4  ;;  %v3034_v59 = vpop.f32.mrb[59].mxu1  ;;  %v1321_v4 = vld [vmem:[#allocation2 + $0x1] sm:$0xff]  ;;  %v1254_v11 = vpop.permute.xlu1 %1253 }
 0x15c   : > { %vm1178_vm5 = vcmp.ge.f32.partialorder %v1168_v19, 0.0  ;;  %v1188_v25 = vmul.f32 0.2, %v1168_v19  ;;  %v1169_v61 = vadd.f32 %v3793_v26, %v1052_v22 }
 0x15d   : > { %1290 = vst.msk [vmem:[#allocation2 + $0x13] sm:$0xff] %vm335_vm0, %v1277_v27 }
 0x15e   : > { %v1198_v32 = vsel %vm1178_vm5, %v1168_v19, %v1188_v25  ;;  %vm1179_vm6 = vcmp.ge.f32.partialorder %v1169_v61, 0.0  ;;  %v1189_v34 = vmul.f32 0.2, %v1169_v61  ;;  %v3349_v19 = vld [vmem:[%s4147_s2 + $0x38] sm:$0xff]  }
 0x15f   : > { %v1208_v31 = vmul.f32 1.4142135, %v1198_v32  ;;  %v1026_v2 = vpop.f32.mrb[60].mxu0 }
 0x160   : > { %v1199_v38 = vsel %vm1179_vm6, %v1169_v61, %v1189_v34  ;;  %v904_v42 = vpop.f32.mrb[60].mxu1  ;;  %v1053_v20 = vadd.f32 %v1026_v2, %v3761_v8  ;;  %v3057_v35 = vpop.f32.mrb[61].mxu0  ;;  %v3346_v8 = vld [vmem:[%s4147_s2 + $0x20] sm:$0xff]  }
 0x161   : > { %v1278_v46 = vmul.f32 %v1239_v6, %v1208_v31  ;;  %v1209_v49 = vmul.f32 1.4142135, %v1199_v38  ;;  %v3817_v36 = vadd.f32 %v904_v42, %v3763_v58  ;;  %v3037_v50 = vpop.f32.mrb[61].mxu1  ;;  %v1029_v52 = vpop.f32.mrb[62].mxu0 }
 0x162   : > { %v1170_v30 = vadd.f32 %v3793_v26, %v1053_v20  ;;  %v907_v55 = vpop.f32.mrb[62].mxu1  ;;  %v1054_v56 = vadd.f32 %v1029_v52, %v3766_v14  ;;  %v3058_v41 = vpop.f32.mrb[63].mxu0  ;;  %v1322_v57 = vld [vmem:[#allocation2 + $0x9] sm:$0xff] }
 0x163   : > { %v1303_v62 = vld [vmem:[#allocation2 + $0x8] sm:$0xff]  ;;  %1291 = vst.msk [vmem:[#allocation2 + $0x1b] sm:$0xff] %vm335_vm0, %v1278_v46  ;;  %v1279_v48 = vmul.f32 %v1244_v16, %v1209_v49  ;;  %v3826_v58 = vadd.f32 %v907_v55, %v3768_v17  ;;  %v1331_v0 = vpack.c.bf16 %v1322_v57, %v1321_v4  ;;  %v3038_v3 = vpop.f32.mrb[63].mxu1  ;;  %v1249_v6 = vpop.permute.xlu0 %1248 }
 0x164   : > { %v1312_v39 = vpack.c.bf16 %v1303_v62, %v1302_v45  ;;  %vm1180_vm7 = vcmp.ge.f32.partialorder %v1170_v30, 0.0  ;;  %v1190_v47 = vmul.f32 0.2, %v1170_v30  ;;  %v1171_v14 = vadd.f32 %v3793_v26, %v1054_v56  ;;  %v1323_v25 = vld [vmem:[#allocation2 + $0x11] sm:$0xff]  ;;  %v1264_v49 = vpop.permute.xlu1 %1263 }
 0x165   : > { %1292 = vst.msk [vmem:[#allocation2 + $0x23] sm:$0xff] %vm335_vm0, %v1279_v48  ;;  %3096 = vmatmul.mubr.msk.bf16.vlgmr.msra.gmra.mrb[72].mxu0 %vm335_vm0, %v1331_v0  ;;  %v1304_v31 = vld [vmem:[#allocation2 + $0x10] sm:$0xff] }
 0x166   : > { %3120 = vmatmul.mubr.msk.bf16.vlgmr.msra.gmra.mrb[88].mxu1 %vm335_vm0, %v1312_v39  ;;  %v1200_v17 = vsel %vm1180_vm7, %v1170_v30, %v1190_v47  ;;  %vm1181_vm8 = vcmp.ge.f32.partialorder %v1171_v14, 0.0  ;;  %v1191_v7 = vmul.f32 0.2, %v1171_v14  ;;  %3140 = vmatpush3.bf16.msra.mxu0 %v3346_v8 }
 0x167   : > { %3099 = vmatprep.mubr.msk.bf16.mxu0 %vm3369_vm1, %v3368_v1  ;;  %v1210_v51 = vmul.f32 1.4142135, %v1200_v17  ;;  %v1034_v12 = vpop.f32.mrb[64].mxu0  ;;  %3123 = vmatprep.mubr.msk.bf16.mxu1 %vm3369_vm1, %v3368_v1  ;;  %v1259_v45 = vpop.permute.xlu0 %1258 }
 0x168   : > { %3141 = vmatprep.subr.bf16.mxu0 %v3368_v1  ;;  %v1201_v13 = vsel %vm1181_vm8, %v1171_v14, %v1191_v7  ;;  %v912_v54 = vpop.f32.mrb[64].mxu1  ;;  %v1055_v15 = vadd.f32 %v1034_v12, %v3771_v21  ;;  %v3061_v18 = vpop.f32.mrb[65].mxu0  ;;  %3164 = vmatpush3.bf16.msra.mxu1 %v3348_v53 }
 0x169   : > { %v1280_v5 = vmul.f32 %v1249_v6, %v1210_v51  ;;  %v1211_v22 = vmul.f32 1.4142135, %v1201_v13  ;;  %v3848_v24 = vadd.f32 %v912_v54, %v3773_v23  ;;  %v3041_v27 = vpop.f32.mrb[65].mxu1  ;;  %v1037_v59 = vpop.f32.mrb[66].mxu0  ;;  %3165 = vmatprep.subr.bf16.mxu1 %v3368_v1 }
 0x16a   : > { %v1172_v61 = vadd.f32 %v3793_v26, %v1055_v15  ;;  %v915_v32 = vpop.f32.mrb[66].mxu1  ;;  %v1056_v21 = vadd.f32 %v1037_v59, %v3776_v28  ;;  %v3062_v34 = vpop.f32.mrb[67].mxu0  ;;  %v1324_v16 = vld [vmem:[#allocation2 + $0x19] sm:$0xff]  ;;  %3142 = vmatpush3.bf16.msra.mxu0 %v3347_v9 }
 0x16b   : > { %v1305_v2 = vld [vmem:[#allocation2 + $0x18] sm:$0xff]  ;;  %1293 = vst.msk [vmem:[#allocation2 + $0x2b] sm:$0xff] %vm335_vm0, %v1280_v5  ;;  %v1281_v38 = vmul.f32 %v1254_v11, %v1211_v22  ;;  %v3855_v23 = vadd.f32 %v915_v32, %v3778_v29  ;;  %v1332_v42 = vpack.c.bf16 %v1324_v16, %v1323_v25  ;;  %v3042_v35 = vpop.f32.mrb[67].mxu1  ;;  %3187 = vmatprep.subr.bf16.mxu0 %v3368_v1  ;;  %v1269_v15 = vpop.permute.xlu0 %1268 }
 0x16c   : > { %v1313_v20 = vpack.c.bf16 %v1305_v2, %v1304_v31  ;;  %vm1182_vm9 = vcmp.ge.f32.partialorder %v1172_v61, 0.0  ;;  %v1192_v4 = vmul.f32 0.2, %v1172_v61  ;;  %v1173_v28 = vadd.f32 %v3793_v26, %v1056_v21  ;;  %3166 = vmatpush3.bf16.msra.mxu1 %v3349_v19  ;;  %v1325_v39 = vld [vmem:[#allocation2 + $0x21] sm:$0xff]  ;;  %v1274_v25 = vpop.permute.xlu1 %1273 }
 0x16d   : > { %1294 = vst.msk [vmem:[#allocation2 + $0x33] sm:$0xff] %vm335_vm0, %v1281_v38  ;;  %3100 = vmatmul.mubr.msk.bf16.gmra.mrb[76].mxu0 %vm335_vm0, %v1332_v42  ;;  %3211 = vmatprep.subr.bf16.mxu1 %v3368_v1  ;;  %v1306_v17 = vld [vmem:[#allocation2 + $0x20] sm:$0xff] }
 0x16e   : > { %3124 = vmatmul.mubr.msk.bf16.gmra.mrb[92].mxu1 %vm335_vm0, %v1313_v20  ;;  %v1202_v46 = vsel %vm1182_vm9, %v1172_v61, %v1192_v4  ;;  %vm1183_vm10 = vcmp.ge.f32.partialorder %v1173_v28, 0.0  ;;  %v1193_v29 = vmul.f32 0.2, %v1173_v28  ;;  %3103 = vmatprep.mubr.msk.bf16.mxu0 %vm3369_vm1, %v3368_v1 }
 0x16f   : > { %3127 = vmatprep.mubr.msk.bf16.mxu1 %vm3369_vm1, %v3368_v1  ;;  %v1212_v50 = vmul.f32 1.4142135, %v1202_v46  ;;  %v1042_v52 = vpop.f32.mrb[68].mxu0 }
 0x170   : > { %v1203_v30 = vsel %vm1183_vm10, %v1173_v28, %v1193_v29  ;;  %v1057_v55 = vadd.f32 %v1042_v52, %v3781_v33  ;;  %v1110_v56 = vpop.f32.mrb[68].mxu1  ;;  %v3065_v41 = vpop.f32.mrb[69].mxu0 }
 0x171   : > { %v1282_v57 = vmul.f32 %v1259_v45, %v1212_v50  ;;  %v1213_v62 = vmul.f32 1.4142135, %v1203_v30  ;;  %v3869_v8 = vadd.f32 %v1110_v56, %v3783_v37  ;;  %v3073_v48 = vpop.f32.mrb[69].mxu1  ;;  %v1045_v0 = vpop.f32.mrb[70].mxu0  ;;  %v1541_v30 = vld [vmem:[#allocation2 + $0x2] sm:$0xff]  ;;  %v1672_v56 = vld [vmem:[#allocation2 + $0x12] sm:$0xff] }
 0x172   : > { %v1174_v3 = vadd.f32 %v3793_v26, %v1057_v55  ;;  %v1058_v47 = vadd.f32 %v1045_v0, %v3786_v40  ;;  %v1113_v14 = vpop.f32.mrb[70].mxu1  ;;  %v3066_v53 = vpop.f32.mrb[71].mxu0  ;;  %v1326_v6 = vld [vmem:[#allocation2 + $0x29] sm:$0xff] }
 0x173   : > { %v1307_v7 = vld [vmem:[#allocation2 + $0x28] sm:$0xff]  ;;  %1295 = vst.msk [vmem:[#allocation2 + $0x3b] sm:$0xff] %vm335_vm0, %v1282_v57  ;;  %v1283_v33 = vmul.f32 %v1264_v49, %v1213_v62  ;;  %v3875_v9 = vadd.f32 %v1113_v14, %v3788_v44  ;;  %v1333_v37 = vpack.c.bf16 %v1326_v6, %v1325_v39  ;;  %v3074_v51 = vpop.f32.mrb[71].mxu1  ;;  %v3350_v62 = vld [vmem:[%s4147_s2 + $0x40] sm:$0xff]   ;;  %v3353_v6 = vld [vmem:[%s4147_s2 + $0x58] sm:$0xff]  }
 0x174   : > { %v1314_v11 = vpack.c.bf16 %v1307_v7, %v1306_v17  ;;  %vm1184_vm11 = vcmp.ge.f32.partialorder %v1174_v3, 0.0  ;;  %v1194_v12 = vmul.f32 0.2, %v1174_v3  ;;  %v1175_v13 = vadd.f32 %v3793_v26, %v1058_v47  ;;  %v1327_v59 = vld [vmem:[#allocation2 + $0x31] sm:$0xff]  ;;  %v1544_v14 = vld [vmem:[#allocation2 + $0x1a] sm:$0xff]  ;;  %v1674_v53 = vld [vmem:[#allocation2 + $0x22] sm:$0xff] }
 0x175   : > { %1296 = vst.msk [vmem:[#allocation2 + $0x43] sm:$0xff] %vm335_vm0, %v1283_v33  ;;  %3104 = vmatmul.mubr.msk.bf16.gmra.mrb[80].mxu0 %vm335_vm0, %v1333_v37  ;;  %v1308_v21 = vld [vmem:[#allocation2 + $0x30] sm:$0xff]  ;;  %v1682_v51 = vpack.c.bf16 %v1674_v53, %v1544_v14 }
 0x176   : > { %3128 = vmatmul.mubr.msk.bf16.gmra.mrb[96].mxu1 %vm335_vm0, %v1314_v11  ;;  %v1204_v40 = vsel %vm1184_vm11, %v1174_v3, %v1194_v12  ;;  %vm1185_vm12 = vcmp.ge.f32.partialorder %v1175_v13, 0.0  ;;  %v1195_v54 = vmul.f32 0.2, %v1175_v13  ;;  %3107 = vmatprep.mubr.msk.bf16.mxu0 %vm3369_vm1, %v3368_v1  ;;  %v1542_v55 = vld [vmem:[#allocation2 + $0xa] sm:$0xff]  ;;  %v1552_v11 = vpack.c.bf16 %v1544_v14, %v1672_v56 }
 0x177   : > { %3131 = vmatprep.mubr.msk.bf16.mxu1 %vm3369_vm1, %v3368_v1  ;;  %v1214_v44 = vmul.f32 1.4142135, %v1204_v40  ;;  %v1551_v0 = vpack.c.bf16 %v1542_v55, %v1541_v30  ;;  %v1681_v39 = vpack.c.bf16 %v1672_v56, %v1542_v55  ;;  %v3352_v47 = vld [vmem:[%s4147_s2 + $0x50] sm:$0xff]  }
 0x178   : > { %v1205_v18 = vsel %vm1185_vm12, %v1175_v13, %v1195_v54  ;;  %v1118_v19 = vpop.f32.mrb[72].mxu1 }
 0x179   : > { %v1284_v26 = vmul.f32 %v1269_v15, %v1214_v44  ;;  %v1215_v5 = vmul.f32 1.4142135, %v1205_v18  ;;  %v3886_v22 = vadd.f32 %v1118_v19, %v3795_v43  ;;  %v3077_v27 = vpop.f32.mrb[73].mxu1 }
 0x17a   : > { %v1121_v61 = vpop.f32.mrb[74].mxu1  ;;  %v1328_v32 = vld [vmem:[#allocation2 + $0x39] sm:$0xff] }
 0x17b   : > { %v1309_v34 = vld [vmem:[#allocation2 + $0x38] sm:$0xff]  ;;  %1297 = vst.msk [vmem:[#allocation2 + $0x4b] sm:$0xff] %vm335_vm0, %v1284_v26  ;;  %v1285_v16 = vmul.f32 %v1274_v25, %v1215_v5  ;;  %v3890_v31 = vadd.f32 %v1121_v61, %v3800_v60  ;;  %v1334_v2 = vpack.c.bf16 %v1328_v32, %v1327_v59  ;;  %v3078_v42 = vpop.f32.mrb[75].mxu1  ;;  %v1801_v61 = vld [vmem:[#allocation2 + $0xb] sm:$0xff] }
 0x17c   : > { %v1315_v38 = vpack.c.bf16 %v1309_v34, %v1308_v21  ;;  %v1329_v35 = vld [vmem:[#allocation2 + $0x41] sm:$0xff]  ;;  %v1802_v59 = vld [vmem:[#allocation2 + $0x13] sm:$0xff] }
 0x17d   : > { %1298 = vst.msk [vmem:[#allocation2 + $0x53] sm:$0xff] %vm335_vm0, %v1285_v16  ;;  %3108 = vmatmul.mubr.msk.bf16.gmra.mrb[84].mxu0 %vm335_vm0, %v1334_v2  ;;  %v1310_v45 = vld [vmem:[#allocation2 + $0x40] sm:$0xff]  ;;  %v3969_v25 = vld [vmem:[#allocation2 + $0x14] sm:$0xff]  ;;  %v1931_v32 = vld [vmem:[#allocation2 + $0xc] sm:$0xff]  ;;  %v1811_v34 = vpack.c.bf16 %v1802_v59, %v1801_v61 }
 0x17e   : > { %3132 = vmatmul.mubr.msk.bf16.gmra.mrb[100].mxu1 %vm335_vm0, %v1315_v38  ;;  %3111 = vmatprep.mubr.msk.bf16.mxu0 %vm3369_vm1, %v3368_v1  ;;  %v1548_v54 = vld [vmem:[#allocation2 + $0x3a] sm:$0xff]  ;;  %v1678_v44 = vld [vmem:[#allocation2 + $0x42] sm:$0xff]  ;;  %v1941_v16 = vpack.c.bf16 %v3969_v25, %v1931_v32  ;;  %v3356_v2 = vld [vmem:[%s4147_s2 + $0x70] sm:$0xff]  }
 0x17f   : > { %3135 = vmatprep.mubr.msk.bf16.mxu1 %vm3369_vm1, %v3368_v1  ;;  %v1684_v18 = vpack.c.bf16 %v1678_v44, %v1548_v54  ;;  %v3354_v21 = vld [vmem:[%s4147_s2 + $0x60] sm:$0xff]   ;;  %v3355_v38 = vld [vmem:[%s4147_s2 + $0x68] sm:$0xff]  }
 0x180   : > { %v1126_v43 = vpop.f32.mrb[76].mxu1  ;;  %v1804_v42 = vld [vmem:[#allocation2 + $0x23] sm:$0xff] }
 0x181   : > { %v3900_v20 = vadd.f32 %v1126_v43, %v3805_v63  ;;  %v3081_v60 = vpop.f32.mrb[77].mxu1  ;;  %v3988_v43 = vld [vmem:[#allocation2 + $0x24] sm:$0xff] }
 0x182   : > { %v1129_v4 = vpop.f32.mrb[78].mxu1  ;;  %v1330_v28 = vld [vmem:[#allocation2 + $0x49] sm:$0xff]  ;;  %v3357_v60 = vld [vmem:[%s4147_s2 + $0x78] sm:$0xff]  }
 0x183   : > { %v1311_v46 = vld [vmem:[#allocation2 + $0x48] sm:$0xff]  ;;  %v3903_v29 = vadd.f32 %v1129_v4, %v3811_v10  ;;  %v1335_v49 = vpack.c.bf16 %v1330_v28, %v1329_v35  ;;  %v3082_v52 = vpop.f32.mrb[79].mxu1  ;;  %v1803_v35 = vld [vmem:[#allocation2 + $0x1b] sm:$0xff] }
 0x184   : > { %v1316_v50 = vpack.c.bf16 %v1311_v46, %v1310_v45  ;;  %v1550_v19 = vld [vmem:[#allocation2 + $0x4a] sm:$0xff]  ;;  %v1680_v26 = vld [vmem:[#allocation2 + $0x52] sm:$0xff]  ;;  %v1933_v4 = vld [vmem:[#allocation2 + $0x1c] sm:$0xff]  ;;  %v1812_v28 = vpack.c.bf16 %v1804_v42, %v1803_v35 }
 0x185   : > { %3112 = vmatmul.mubr.msk.bf16.gmra.mrb[88].mxu0 %vm335_vm0, %v1335_v49  ;;  %v1555_v5 = vpack.c.bf16 %v1550_v19, %v1678_v44  ;;  %v1685_v27 = vpack.c.bf16 %v1680_v26, %v1550_v19  ;;  %v1942_v45 = vpack.c.bf16 %v3988_v43, %v1933_v4  ;;  %v1806_v46 = vld [vmem:[#allocation2 + $0x33] sm:$0xff]  ;;  %v1808_v55 = vld [vmem:[#allocation2 + $0x43] sm:$0xff] }
 0x186   : > { %3136 = vmatmul.mubr.msk.bf16.gmra.mrb[104].mxu1 %vm335_vm0, %v1316_v50  ;;  %3143 = vmatprep.mubr.msk.bf16.mxu0 %vm3369_vm1, %v3368_v1  ;;  %v1936_v49 = vld [vmem:[#allocation2 + $0x34] sm:$0xff]  ;;  %v1805_v50 = vld [vmem:[#allocation2 + $0x2b] sm:$0xff] }
 0x187   : > { %3167 = vmatprep.mubr.msk.bf16.mxu1 %vm3369_vm1, %v3368_v1  ;;  %v1935_v52 = vld [vmem:[#allocation2 + $0x2c] sm:$0xff]  ;;  %v1938_v56 = vld [vmem:[#allocation2 + $0x44] sm:$0xff]  ;;  %v2199_v59 = vld [vmem:[#allocation2 + $0x55] sm:$0xff] }
 0x188   : > { %v1134_v63 = vpop.f32.mrb[80].mxu1  ;;  %v1943_v30 = vpack.c.bf16 %v1936_v49, %v1935_v52  ;;  %v2197_v19 = vld [vmem:[#allocation2 + $0x45] sm:$0xff] }
 0x189   : > { %v3912_v10 = vadd.f32 %v1134_v63, %v3817_v36  ;;  %v3085_v41 = vpop.f32.mrb[81].mxu1  ;;  %v3351_v36 = vld [vmem:[%s4147_s2 + $0x48] sm:$0xff]   ;;  %v1813_v63 = vpack.c.bf16 %v1806_v46, %v1805_v50  ;;  %v2329_v46 = vld [vmem:[#allocation2 + $0x56] sm:$0xff] }
 0x18a   : > { %v1137_v57 = vpop.f32.mrb[82].mxu1  ;;  %v1807_v41 = vld [vmem:[#allocation2 + $0x3b] sm:$0xff] }
 0x18b   : > { %v3918_v48 = vadd.f32 %v1137_v57, %v3826_v58  ;;  %v3086_v3 = vpop.f32.mrb[83].mxu1  ;;  %v1937_v57 = vld [vmem:[#allocation2 + $0x3c] sm:$0xff] }
 0x18c   : > { %v1939_v3 = vld [vmem:[#allocation2 + $0x4c] sm:$0xff]  ;;  %v2073_v44 = vpack.c.bf16 %v1937_v57, %v1936_v49  ;;  %v2330_v49 = vld [vmem:[#allocation2 + $0x5e] sm:$0xff] }
 0x18d   : > { %3144 = vmatmul.mubr.msk.bf16.vlgmr.msra.gmra.mrb[92].mxu0 %vm335_vm0, %v1551_v0  ;;  %v1944_v0 = vpack.c.bf16 %v1938_v56, %v1937_v57  ;;  %v2074_v26 = vpack.c.bf16 %v1939_v3, %v1938_v56  ;;  %v2335_v50 = vpack.c.bf16 %v2330_v49, %v2329_v46 }
 0x18e   : > { %3168 = vmatmul.mubr.msk.bf16.vlgmr.msra.gmra.mrb[108].mxu1 %vm335_vm0, %v1681_v39  ;;  %3188 = vmatpush3.bf16.msra.mxu0 %v3350_v62  ;;  %v1814_v62 = vpack.c.bf16 %v1808_v55, %v1807_v41  ;;  %v1810_v39 = vld [vmem:[#allocation2 + $0x53] sm:$0xff] }
 0x18f   : > { %3147 = vmatprep.mubr.msk.bf16.mxu0 %vm3369_vm1, %v3368_v1  ;;  %3171 = vmatprep.mubr.msk.bf16.mxu1 %vm3369_vm1, %v3368_v1 }
 0x190   : > { %3189 = vmatprep.subr.bf16.mxu0 %v3368_v1  ;;  %v1142_v58 = vpop.f32.mrb[84].mxu1  ;;  %3212 = vmatpush3.bf16.msra.mxu1 %v3352_v47  ;;  %v1940_v47 = vld [vmem:[#allocation2 + $0x54] sm:$0xff] }
 0x191   : > { %v3937_v17 = vadd.f32 %v1142_v58, %v3848_v24  ;;  %v3089_v7 = vpop.f32.mrb[85].mxu1  ;;  %3213 = vmatprep.subr.bf16.mxu1 %v3368_v1  ;;  %v1546_v24 = vld [vmem:[#allocation2 + $0x2a] sm:$0xff]  ;;  %v1945_v14 = vpack.c.bf16 %v1940_v47, %v1939_v3 }
 0x192   : > { %v1145_v33 = vpop.f32.mrb[86].mxu1  ;;  %3190 = vmatpush3.bf16.msra.mxu0 %v3351_v36  ;;  %v1553_v13 = vpack.c.bf16 %v1546_v24, %v1674_v53  ;;  %v1809_v36 = vld [vmem:[#allocation2 + $0x4b] sm:$0xff]  ;;  %v2192_v53 = vld [vmem:[#allocation2 + $0x1d] sm:$0xff] }
 0x193   : > { %v3941_v37 = vadd.f32 %v1145_v33, %v3855_v23  ;;  %3235 = vmatprep.subr.bf16.mxu0 %v3368_v1  ;;  %v3090_v12 = vpop.f32.mrb[87].mxu1  ;;  %v1676_v23 = vld [vmem:[#allocation2 + $0x32] sm:$0xff]  ;;  %v1815_v58 = vpack.c.bf16 %v1810_v39, %v1809_v36  ;;  %v3358_v7 = vld [vmem:[%s4147_s2 + $0x80] sm:$0xff]   ;;  %v2071_v33 = vpack.c.bf16 %v1933_v4, %v3969_v25 }
 0x194   : > { %3214 = vmatpush3.bf16.msra.mxu1 %v3353_v6  ;;  %v1683_v40 = vpack.c.bf16 %v1676_v23, %v1546_v24  ;;  %v1554_v15 = vpack.c.bf16 %v1548_v54, %v1676_v23  ;;  %v2191_v6 = vld [vmem:[#allocation2 + $0x15] sm:$0xff]  ;;  %v2194_v12 = vld [vmem:[#allocation2 + $0x2d] sm:$0xff]  ;;  %v2193_v24 = vld [vmem:[#allocation2 + $0x25] sm:$0xff]  ;;  %v2072_v23 = vpack.c.bf16 %v1935_v52, %v3988_v43 }
 0x195   : > { %3148 = vmatmul.mubr.msk.bf16.gmra.mrb[96].mxu0 %vm335_vm0, %v1552_v11  ;;  %3259 = vmatprep.subr.bf16.mxu1 %v3368_v1  ;;  %v2201_v11 = vpack.c.bf16 %v2192_v53, %v2191_v6  ;;  %v2195_v54 = vld [vmem:[#allocation2 + $0x35] sm:$0xff]  ;;  %v2200_v25 = vld [vmem:[#allocation2 + $0x5d] sm:$0xff] }
 0x196   : > { %3172 = vmatmul.mubr.msk.bf16.gmra.mrb[112].mxu1 %vm335_vm0, %v1682_v51  ;;  %3151 = vmatprep.mubr.msk.bf16.mxu0 %vm3369_vm1, %v3368_v1  ;;  %v3359_v51 = vld [vmem:[%s4147_s2 + $0x88] sm:$0xff]   ;;  %v2205_v32 = vpack.c.bf16 %v2200_v25, %v2199_v59  ;;  %v2326_v43 = vld [vmem:[#allocation2 + $0x3e] sm:$0xff] }
 0x197   : > { %3175 = vmatprep.mubr.msk.bf16.mxu1 %vm3369_vm1, %v3368_v1  ;;  %v2328_v4 = vld [vmem:[#allocation2 + $0x4e] sm:$0xff] }
 0x19d   : > { %3152 = vmatmul.mubr.msk.bf16.gmra.mrb[100].mxu0 %vm335_vm0, %v1553_v13  ;;  %v2202_v13 = vpack.c.bf16 %v2194_v12, %v2193_v24 }
 0x19e   : > { %3176 = vmatmul.mubr.msk.bf16.gmra.mrb[116].mxu1 %vm335_vm0, %v1683_v40  ;;  %3155 = vmatprep.mubr.msk.bf16.mxu0 %vm3369_vm1, %v3368_v1  ;;  %v2196_v40 = vld [vmem:[#allocation2 + $0x3d] sm:$0xff] }
 0x19f   : > { %3179 = vmatprep.mubr.msk.bf16.mxu1 %vm3369_vm1, %v3368_v1 }
 0x1a5   : > { %3156 = vmatmul.mubr.msk.bf16.gmra.mrb[104].mxu0 %vm335_vm0, %v1554_v15  ;;  %v2203_v15 = vpack.c.bf16 %v2196_v40, %v2195_v54 }
 0x1a6   : > { %3180 = vmatmul.mubr.msk.bf16.gmra.mrb[120].mxu1 %vm335_vm0, %v1684_v18  ;;  %3159 = vmatprep.mubr.msk.bf16.mxu0 %vm3369_vm1, %v3368_v1  ;;  %v2198_v18 = vld [vmem:[#allocation2 + $0x4d] sm:$0xff] }
 0x1a7   : > { %3183 = vmatprep.mubr.msk.bf16.mxu1 %vm3369_vm1, %v3368_v1 }
 0x1ad   : > { %3160 = vmatmul.mubr.msk.bf16.gmra.mrb[108].mxu0 %vm335_vm0, %v1555_v5  ;;  %v2204_v5 = vpack.c.bf16 %v2198_v18, %v2197_v19 }
 0x1ae   : > { %3184 = vmatmul.mubr.msk.bf16.gmra.mrb[124].mxu1 %vm335_vm0, %v1685_v27  ;;  %3191 = vmatprep.mubr.msk.bf16.mxu0 %vm3369_vm1, %v3368_v1  ;;  %v2070_v27 = vld [vmem:[#allocation2 + $0x5c] sm:$0xff] }
 0x1af   : > { %3215 = vmatprep.mubr.msk.bf16.mxu1 %vm3369_vm1, %v3368_v1  ;;  %v2075_v61 = vpack.c.bf16 %v2070_v27, %v1940_v47 }
 0x1b5   : > { %3192 = vmatmul.mubr.msk.bf16.vlgmr.msra.gmra.mrb[112].mxu0 %vm335_vm0, %v1811_v34  ;;  %v2321_v34 = vld [vmem:[#allocation2 + $0x16] sm:$0xff] }
 0x1b6   : > { %3216 = vmatmul.mubr.msk.bf16.vlgmr.msra.gmra.mrb[128].mxu1 %vm335_vm0, %v1941_v16  ;;  %3236 = vmatpush3.bf16.msra.mxu0 %v3354_v21  ;;  %v2322_v21 = vld [vmem:[#allocation2 + $0x1e] sm:$0xff] }
 0x1b7   : > { %3195 = vmatprep.mubr.msk.bf16.mxu0 %vm3369_vm1, %v3368_v1  ;;  %3219 = vmatprep.mubr.msk.bf16.mxu1 %vm3369_vm1, %v3368_v1  ;;  %v2331_v16 = vpack.c.bf16 %v2322_v21, %v2321_v34 }
 0x1b8   : > { %3237 = vmatprep.subr.bf16.mxu0 %v3368_v1  ;;  %3260 = vmatpush3.bf16.msra.mxu1 %v3356_v2  ;;  %v2324_v2 = vld [vmem:[#allocation2 + $0x2e] sm:$0xff] }
 0x1b9   : > { %3261 = vmatprep.subr.bf16.mxu1 %v3368_v1 }
 0x1ba   : > { %3238 = vmatpush3.bf16.msra.mxu0 %v3355_v38  ;;  %v2323_v38 = vld [vmem:[#allocation2 + $0x26] sm:$0xff] }
 0x1bb   : > { %3283 = vmatprep.subr.bf16.mxu0 %v3368_v1  ;;  %v2332_v42 = vpack.c.bf16 %v2324_v2, %v2323_v38 }
 0x1bc   : > { %3262 = vmatpush3.bf16.msra.mxu1 %v3357_v60  ;;  %v2325_v60 = vld [vmem:[#allocation2 + $0x36] sm:$0xff] }
 0x1bd   : > { %3196 = vmatmul.mubr.msk.bf16.gmra.mrb[116].mxu0 %vm335_vm0, %v1812_v28  ;;  %v2333_v35 = vpack.c.bf16 %v2326_v43, %v2325_v60  ;;  %v2327_v28 = vld [vmem:[#allocation2 + $0x46] sm:$0xff] }
 0x1be   : > { %3220 = vmatmul.mubr.msk.bf16.gmra.mrb[132].mxu1 %vm335_vm0, %v1942_v45  ;;  %3199 = vmatprep.mubr.msk.bf16.mxu0 %vm3369_vm1, %v3368_v1  ;;  %v2334_v45 = vpack.c.bf16 %v2328_v4, %v2327_v28 }
 0x1bf   : > { %3223 = vmatprep.mubr.msk.bf16.mxu1 %vm3369_vm1, %v3368_v1 }
 0x1c5   : > { %3200 = vmatmul.mubr.msk.bf16.gmra.mrb[120].mxu0 %vm335_vm0, %v1813_v63 }
 0x1c6   : > { %3224 = vmatmul.mubr.msk.bf16.gmra.mrb[136].mxu1 %vm335_vm0, %v1943_v30  ;;  %3203 = vmatprep.mubr.msk.bf16.mxu0 %vm3369_vm1, %v3368_v1 }
 0x1c7   : > { %3227 = vmatprep.mubr.msk.bf16.mxu1 %vm3369_vm1, %v3368_v1 }
 0x1cd   : > { %3204 = vmatmul.mubr.msk.bf16.gmra.mrb[124].mxu0 %vm335_vm0, %v1814_v62 }
 0x1ce   : > { %3228 = vmatmul.mubr.msk.bf16.gmra.mrb[140].mxu1 %vm335_vm0, %v1944_v0  ;;  %3207 = vmatprep.mubr.msk.bf16.mxu0 %vm3369_vm1, %v3368_v1 }
 0x1cf   : > { %3231 = vmatprep.mubr.msk.bf16.mxu1 %vm3369_vm1, %v3368_v1 }
 0x1d5   : > { %3208 = vmatmul.mubr.msk.bf16.gmra.mrb[128].mxu0 %vm335_vm0, %v1815_v58 }
 0x1d6   : > { %3232 = vmatmul.mubr.msk.bf16.gmra.mrb[144].mxu1 %vm335_vm0, %v1945_v14  ;;  %3239 = vmatprep.mubr.msk.bf16.mxu0 %vm3369_vm1, %v3368_v1 }
 0x1d7   : > { %3263 = vmatprep.mubr.msk.bf16.mxu1 %vm3369_vm1, %v3368_v1 }
 0x1dd   : > { %3240 = vmatmul.mubr.msk.bf16.vlgmr.msra.gmra.mrb[132].mxu0 %vm335_vm0, %v2071_v33 }
 0x1de   : > { %3264 = vmatmul.mubr.msk.bf16.vlgmr.msra.gmra.mrb[148].mxu1 %vm335_vm0, %v2201_v11  ;;  %3284 = vmatpush3.bf16.msra.mxu0 %v3358_v7 }
 0x1df   : > { %3243 = vmatprep.mubr.msk.bf16.mxu0 %vm3369_vm1, %v3368_v1  ;;  %3267 = vmatprep.mubr.msk.bf16.mxu1 %vm3369_vm1, %v3368_v1 }
 0x1e0   : > { %3285 = vmatprep.subr.bf16.mxu0 %v3368_v1 }
 0x1e2   : > { %3286 = vmatpush3.bf16.msra.mxu0 %v3359_v51 }
 0x1e5   : > { %3244 = vmatmul.mubr.msk.bf16.gmra.mrb[136].mxu0 %vm335_vm0, %v2072_v23 }
 0x1e6   : > { %3268 = vmatmul.mubr.msk.bf16.gmra.mrb[152].mxu1 %vm335_vm0, %v2202_v13  ;;  %3247 = vmatprep.mubr.msk.bf16.mxu0 %vm3369_vm1, %v3368_v1 }
 0x1e7   : > { %3271 = vmatprep.mubr.msk.bf16.mxu1 %vm3369_vm1, %v3368_v1 }
 0x1ed   : > { %3248 = vmatmul.mubr.msk.bf16.gmra.mrb[140].mxu0 %vm335_vm0, %v2073_v44 }
 0x1ee   : > { %3272 = vmatmul.mubr.msk.bf16.gmra.mrb[156].mxu1 %vm335_vm0, %v2203_v15  ;;  %3251 = vmatprep.mubr.msk.bf16.mxu0 %vm3369_vm1, %v3368_v1 }
 0x1ef   : > { %3275 = vmatprep.mubr.msk.bf16.mxu1 %vm3369_vm1, %v3368_v1 }
 0x1f5   : > { %3252 = vmatmul.mubr.msk.bf16.gmra.mrb[144].mxu0 %vm335_vm0, %v2074_v26 }
 0x1f6   : > { %3276 = vmatmul.mubr.msk.bf16.gmra.mrb[160].mxu1 %vm335_vm0, %v2204_v5  ;;  %3255 = vmatprep.mubr.msk.bf16.mxu0 %vm3369_vm1, %v3368_v1 }
 0x1f7   : > { %3279 = vmatprep.mubr.msk.bf16.mxu1 %vm3369_vm1, %v3368_v1 }
 0x1fd   : > { %3256 = vmatmul.mubr.msk.bf16.gmra.mrb[148].mxu0 %vm335_vm0, %v2075_v61 }
 0x1fe   : > { %3280 = vmatmul.mubr.msk.bf16.gmra.mrb[164].mxu1 %vm335_vm0, %v2205_v32  ;;  %3287 = vmatprep.mubr.msk.bf16.mxu0 %vm3369_vm1, %v3368_v1 }
 0x205   : > { %3288 = vmatmul.mubr.msk.bf16.vlgmr.msra.gmra.mrb[152].mxu0 %vm335_vm0, %v2331_v16 }
 0x206   : > { %3291 = vmatprep.mubr.msk.bf16.mxu0 %vm3369_vm1, %v3368_v1 }
 0x20d   : > { %3292 = vmatmul.mubr.msk.bf16.gmra.mrb[156].mxu0 %vm335_vm0, %v2332_v42 }
 0x20e   : > { %3295 = vmatprep.mubr.msk.bf16.mxu0 %vm3369_vm1, %v3368_v1 }
 0x215   : > { %3296 = vmatmul.mubr.msk.bf16.gmra.mrb[160].mxu0 %vm335_vm0, %v2333_v35 }
 0x216   : > { %3299 = vmatprep.mubr.msk.bf16.mxu0 %vm3369_vm1, %v3368_v1 }
 0x21d   : > { %3300 = vmatmul.mubr.msk.bf16.gmra.mrb[164].mxu0 %vm335_vm0, %v2334_v45 }
 0x21e   : > { %3303 = vmatprep.mubr.msk.bf16.mxu0 %vm3369_vm1, %v3368_v1 }
 0x225   : > { %3304 = vmatmul.mubr.msk.bf16.gmra.mrb[168].mxu0 %vm335_vm0, %v2335_v50 }
 0x238   : > { %v1402_v52 = vpop.f32.mrb[72].mxu0 }
 0x239   : > { %v1502_v63 = vpop.f32.mrb[88].mxu1  ;;  %v3097_v55 = vpop.f32.mrb[73].mxu0 }
 0x23a   : > { %v1503_v30 = vadd.f32 %v1502_v63, %v1402_v52  ;;  %v3121_v56 = vpop.f32.mrb[89].mxu1  ;;  %v1405_v41 = vpop.f32.mrb[74].mxu0 }
 0x23b   : > { %v1505_v57 = vpop.f32.mrb[90].mxu1  ;;  %v3098_v0 = vpop.f32.mrb[75].mxu0 }
 0x23c   : > { %v1506_v62 = vadd.f32 %v1505_v57, %v1405_v41  ;;  %v3122_v39 = vpop.f32.mrb[91].mxu1 }
 0x240   : > { %v1410_v3 = vpop.f32.mrb[76].mxu0 }
 0x241   : > { %v1510_v47 = vpop.f32.mrb[92].mxu1  ;;  %v3101_v58 = vpop.f32.mrb[77].mxu0 }
 0x242   : > { %v1511_v36 = vadd.f32 %v1510_v47, %v1410_v3  ;;  %v3125_v1 = vpop.f32.mrb[93].mxu1  ;;  %v1413_v14 = vpop.f32.mrb[78].mxu0 }
 0x243   : > { %v1513_v53 = vpop.f32.mrb[94].mxu1  ;;  %v3102_v7 = vpop.f32.mrb[79].mxu0 }
 0x244   : > { %v1514_v6 = vadd.f32 %v1513_v53, %v1413_v14  ;;  %v3126_v33 = vpop.f32.mrb[95].mxu1 }
 0x248   : > { %v1418_v11 = vpop.f32.mrb[80].mxu0 }
 0x249   : > { %v1518_v51 = vpop.f32.mrb[96].mxu1  ;;  %v3105_v24 = vpop.f32.mrb[81].mxu0 }
 0x24a   : > { %v1519_v12 = vadd.f32 %v1518_v51, %v1418_v11  ;;  %v3129_v23 = vpop.f32.mrb[97].mxu1  ;;  %v1421_v13 = vpop.f32.mrb[82].mxu0 }
 0x24b   : > { %v1521_v40 = vpop.f32.mrb[98].mxu1  ;;  %v3106_v44 = vpop.f32.mrb[83].mxu0 }
 0x24c   : > { %v1522_v54 = vadd.f32 %v1521_v40, %v1421_v13  ;;  %v3130_v15 = vpop.f32.mrb[99].mxu1 }
 0x250   : > { %v1426_v18 = vpop.f32.mrb[84].mxu0 }
 0x251   : > { %v1526_v19 = vpop.f32.mrb[100].mxu1  ;;  %v3109_v5 = vpop.f32.mrb[85].mxu0 }
 0x252   : > { %v1527_v26 = vadd.f32 %v1526_v19, %v1426_v18  ;;  %v3133_v27 = vpop.f32.mrb[101].mxu1  ;;  %v1429_v59 = vpop.f32.mrb[86].mxu0 }
 0x253   : > { %v1529_v25 = vpop.f32.mrb[102].mxu1  ;;  %v3110_v32 = vpop.f32.mrb[87].mxu0 }
 0x254   : > { %v1530_v61 = vadd.f32 %v1529_v25, %v1429_v59  ;;  %v3134_v21 = vpop.f32.mrb[103].mxu1 }
 0x258   : > { %v1434_v34 = vpop.f32.mrb[88].mxu0 }
 0x259   : > { %v1534_v16 = vpop.f32.mrb[104].mxu1  ;;  %v3113_v38 = vpop.f32.mrb[89].mxu0 }
 0x25a   : > { %v1535_v2 = vadd.f32 %v1534_v16, %v1434_v34  ;;  %v3137_v42 = vpop.f32.mrb[105].mxu1  ;;  %v1437_v43 = vpop.f32.mrb[90].mxu0 }
 0x25b   : > { %v1537_v60 = vpop.f32.mrb[106].mxu1  ;;  %v3114_v4 = vpop.f32.mrb[91].mxu0 }
 0x25c   : > { %v1538_v35 = vadd.f32 %v1537_v60, %v1437_v43  ;;  %v3138_v28 = vpop.f32.mrb[107].mxu1 }
 0x260   : > { %v1622_v45 = vpop.f32.mrb[92].mxu0 }
 0x261   : > { %v1752_v46 = vpop.f32.mrb[108].mxu1  ;;  %v1661_v49 = vadd.f32 %v1622_v45, %v1503_v30  ;;  %v3145_v50 = vpop.f32.mrb[93].mxu0 }
 0x262   : > { %v3169_v52 = vpop.f32.mrb[109].mxu1  ;;  %v1625_v63 = vpop.f32.mrb[94].mxu0 }
 0x263   : > { %v1755_v55 = vpop.f32.mrb[110].mxu1  ;;  %v1791_v56 = vadd.f32 %v1752_v46, %v1661_v49  ;;  %v1662_v41 = vadd.f32 %v1625_v63, %v1506_v62  ;;  %v3146_v57 = vpop.f32.mrb[95].mxu0 }
 0x264   : > { %v3170_v0 = vpop.f32.mrb[111].mxu1 }
 0x265   : > { %v1792_v39 = vadd.f32 %v1755_v55, %v1662_v41 }
 0x268   : > { %v1630_v3 = vpop.f32.mrb[96].mxu0 }
 0x269   : > { %v1760_v47 = vpop.f32.mrb[112].mxu1  ;;  %v1663_v58 = vadd.f32 %v1630_v3, %v1511_v36  ;;  %v3149_v1 = vpop.f32.mrb[97].mxu0 }
 0x26a   : > { %v3173_v14 = vpop.f32.mrb[113].mxu1  ;;  %v1633_v53 = vpop.f32.mrb[98].mxu0 }
 0x26b   : > { %v1763_v7 = vpop.f32.mrb[114].mxu1  ;;  %v1793_v33 = vadd.f32 %v1760_v47, %v1663_v58  ;;  %v1664_v11 = vadd.f32 %v1633_v53, %v1514_v6  ;;  %v3150_v51 = vpop.f32.mrb[99].mxu0 }
 0x26c   : > { %v3174_v30 = vpop.f32.mrb[115].mxu1 }
 0x26d   : > { %v1794_v24 = vadd.f32 %v1763_v7, %v1664_v11 }
 0x270   : > { %v1638_v23 = vpop.f32.mrb[100].mxu0 }
 0x271   : > { %v1768_v13 = vpop.f32.mrb[116].mxu1  ;;  %v1665_v40 = vadd.f32 %v1638_v23, %v1519_v12  ;;  %v3153_v44 = vpop.f32.mrb[101].mxu0 }
 0x272   : > { %v3177_v62 = vpop.f32.mrb[117].mxu1  ;;  %v1641_v15 = vpop.f32.mrb[102].mxu0 }
 0x273   : > { %v1771_v18 = vpop.f32.mrb[118].mxu1  ;;  %v1795_v19 = vadd.f32 %v1768_v13, %v1665_v40  ;;  %v1666_v5 = vadd.f32 %v1641_v15, %v1522_v54  ;;  %v3154_v27 = vpop.f32.mrb[103].mxu0 }
 0x274   : > { %v3178_v36 = vpop.f32.mrb[119].mxu1 }
 0x275   : > { %v1796_v59 = vadd.f32 %v1771_v18, %v1666_v5 }
 0x278   : > { %v1646_v25 = vpop.f32.mrb[104].mxu0 }
 0x279   : > { %v1776_v32 = vpop.f32.mrb[120].mxu1  ;;  %v1667_v21 = vadd.f32 %v1646_v25, %v1527_v26  ;;  %v3157_v34 = vpop.f32.mrb[105].mxu0 }
 0x27a   : > { %v3181_v6 = vpop.f32.mrb[121].mxu1  ;;  %v1649_v16 = vpop.f32.mrb[106].mxu0 }
 0x27b   : > { %v1779_v38 = vpop.f32.mrb[122].mxu1  ;;  %v1797_v42 = vadd.f32 %v1776_v32, %v1667_v21  ;;  %v1668_v43 = vadd.f32 %v1649_v16, %v1530_v61  ;;  %v3158_v60 = vpop.f32.mrb[107].mxu0 }
 0x27c   : > { %v3182_v12 = vpop.f32.mrb[123].mxu1 }
 0x27d   : > { %v1798_v4 = vadd.f32 %v1779_v38, %v1668_v43 }
 0x280   : > { %v1654_v28 = vpop.f32.mrb[108].mxu0 }
 0x281   : > { %v1784_v45 = vpop.f32.mrb[124].mxu1  ;;  %v1669_v46 = vadd.f32 %v1654_v28, %v1535_v2  ;;  %v3161_v49 = vpop.f32.mrb[109].mxu0 }
 0x282   : > { %v3185_v54 = vpop.f32.mrb[125].mxu1  ;;  %v1657_v50 = vpop.f32.mrb[110].mxu0 }
 0x283   : > { %v1787_v52 = vpop.f32.mrb[126].mxu1  ;;  %v1799_v63 = vadd.f32 %v1784_v45, %v1669_v46  ;;  %v1670_v55 = vadd.f32 %v1657_v50, %v1538_v35  ;;  %v3162_v41 = vpop.f32.mrb[111].mxu0 }
 0x284   : > { %v3186_v26 = vpop.f32.mrb[127].mxu1 }
 0x285   : > { %v1800_v57 = vadd.f32 %v1787_v52, %v1670_v55 }
 0x288   : > { %v1882_v0 = vpop.f32.mrb[112].mxu0 }
 0x289   : > { %v2012_v3 = vpop.f32.mrb[128].mxu1  ;;  %v1921_v47 = vadd.f32 %v1882_v0, %v1791_v56  ;;  %v3193_v58 = vpop.f32.mrb[113].mxu0 }
 0x28a   : > { %v3217_v61 = vpop.f32.mrb[129].mxu1  ;;  %v1885_v1 = vpop.f32.mrb[114].mxu0 }
 0x28b   : > { %v2015_v14 = vpop.f32.mrb[130].mxu1  ;;  %v2051_v53 = vadd.f32 %v2012_v3, %v1921_v47  ;;  %v1922_v7 = vadd.f32 %v1885_v1, %v1792_v39  ;;  %v3194_v11 = vpop.f32.mrb[115].mxu0 }
 0x28c   : > { %v3218_v2 = vpop.f32.mrb[131].mxu1 }
 0x28d   : > { %v2052_v51 = vadd.f32 %v2015_v14, %v1922_v7 }
 0x290   : > { %v1890_v30 = vpop.f32.mrb[116].mxu0 }
 0x291   : > { %v2020_v23 = vpop.f32.mrb[132].mxu1  ;;  %v1923_v13 = vadd.f32 %v1890_v30, %v1793_v33  ;;  %v3197_v40 = vpop.f32.mrb[117].mxu0 }
 0x292   : > { %v3221_v35 = vpop.f32.mrb[133].mxu1  ;;  %v1893_v44 = vpop.f32.mrb[118].mxu0 }
 0x293   : > { %v2023_v62 = vpop.f32.mrb[134].mxu1  ;;  %v2053_v15 = vadd.f32 %v2020_v23, %v1923_v13  ;;  %v1924_v18 = vadd.f32 %v1893_v44, %v1794_v24  ;;  %v3198_v5 = vpop.f32.mrb[119].mxu0 }
 0x294   : > { %v3222_v56 = vpop.f32.mrb[135].mxu1 }
 0x295   : > { %v2054_v27 = vadd.f32 %v2023_v62, %v1924_v18 }
 0x298   : > { %v1898_v36 = vpop.f32.mrb[120].mxu0 }
 0x299   : > { %v2028_v25 = vpop.f32.mrb[136].mxu1  ;;  %v1925_v32 = vadd.f32 %v1898_v36, %v1795_v19  ;;  %v3201_v21 = vpop.f32.mrb[121].mxu0 }
 0x29a   : > { %v3225_v39 = vpop.f32.mrb[137].mxu1  ;;  %v1901_v34 = vpop.f32.mrb[122].mxu0 }
 0x29b   : > { %v2031_v6 = vpop.f32.mrb[138].mxu1  ;;  %v2055_v16 = vadd.f32 %v2028_v25, %v1925_v32  ;;  %v1926_v38 = vadd.f32 %v1901_v34, %v1796_v59  ;;  %v3202_v43 = vpop.f32.mrb[123].mxu0 }
 0x29c   : > { %v3226_v33 = vpop.f32.mrb[139].mxu1 }
 0x29d   : > { %v2056_v60 = vadd.f32 %v2031_v6, %v1926_v38 }
 0x2a0   : > { %v1906_v12 = vpop.f32.mrb[124].mxu0 }
 0x2a1   : > { %v2036_v28 = vpop.f32.mrb[140].mxu1  ;;  %v1927_v45 = vadd.f32 %v1906_v12, %v1797_v42  ;;  %v3205_v46 = vpop.f32.mrb[125].mxu0 }
 0x2a2   : > { %v3229_v24 = vpop.f32.mrb[141].mxu1  ;;  %v1909_v49 = vpop.f32.mrb[126].mxu0 }
 0x2a3   : > { %v2039_v54 = vpop.f32.mrb[142].mxu1  ;;  %v2057_v50 = vadd.f32 %v2036_v28, %v1927_v45  ;;  %v1928_v52 = vadd.f32 %v1909_v49, %v1798_v4  ;;  %v3206_v55 = vpop.f32.mrb[127].mxu0 }
 0x2a4   : > { %v3230_v19 = vpop.f32.mrb[143].mxu1 }
 0x2a5   : > { %v2058_v41 = vadd.f32 %v2039_v54, %v1928_v52 }
 0x2a8   : > { %v1914_v26 = vpop.f32.mrb[128].mxu0 }
 0x2a9   : > { %v2044_v0 = vpop.f32.mrb[144].mxu1  ;;  %v1929_v3 = vadd.f32 %v1914_v26, %v1799_v63  ;;  %v3209_v47 = vpop.f32.mrb[129].mxu0 }
 0x2aa   : > { %v3233_v59 = vpop.f32.mrb[145].mxu1  ;;  %v1917_v58 = vpop.f32.mrb[130].mxu0 }
 0x2ab   : > { %v2047_v61 = vpop.f32.mrb[146].mxu1  ;;  %v2059_v1 = vadd.f32 %v2044_v0, %v1929_v3  ;;  %v1930_v14 = vadd.f32 %v1917_v58, %v1800_v57  ;;  %v3210_v7 = vpop.f32.mrb[131].mxu0 }
 0x2ac   : > { %v3234_v42 = vpop.f32.mrb[147].mxu1 }
 0x2ad   : > { %v2060_v11 = vadd.f32 %v2047_v61, %v1930_v14 }
 0x2b0   : > { %v2142_v2 = vpop.f32.mrb[132].mxu0 }
 0x2b1   : > { %v2272_v30 = vpop.f32.mrb[148].mxu1  ;;  %v2181_v23 = vadd.f32 %v2142_v2, %v2051_v53  ;;  %v3241_v13 = vpop.f32.mrb[133].mxu0 }
 0x2b2   : > { %v3265_v4 = vpop.f32.mrb[149].mxu1  ;;  %v2145_v40 = vpop.f32.mrb[134].mxu0 }
 0x2b3   : > { %v2275_v35 = vpop.f32.mrb[150].mxu1  ;;  %v2311_v44 = vadd.f32 %v2272_v30, %v2181_v23  ;;  %v2182_v62 = vadd.f32 %v2145_v40, %v2052_v51  ;;  %v3242_v18 = vpop.f32.mrb[135].mxu0 }
 0x2b4   : > { %v3266_v63 = vpop.f32.mrb[151].mxu1 }
 0x2b5   : > { %v2312_v5 = vadd.f32 %v2275_v35, %v2182_v62  ;;  %v4087_v63 = vld [vmem:[%s4150_s5] ss:$0 sm:$0xff] }
 0x2b8   : > { %v2150_v56 = vpop.f32.mrb[136].mxu0 }
 0x2b9   : > { %v2280_v36 = vpop.f32.mrb[152].mxu1  ;;  %v2183_v25 = vadd.f32 %v2150_v56, %v2053_v15  ;;  %v3245_v32 = vpop.f32.mrb[137].mxu0 }
 0x2ba   : > { %v3269_v57 = vpop.f32.mrb[153].mxu1  ;;  %v2153_v21 = vpop.f32.mrb[138].mxu0 }
 0x2bb   : > { %v2283_v39 = vpop.f32.mrb[154].mxu1  ;;  %v2313_v34 = vadd.f32 %v2280_v36, %v2183_v25  ;;  %v2184_v6 = vadd.f32 %v2153_v21, %v2054_v27  ;;  %v3246_v38 = vpop.f32.mrb[139].mxu0 }
 0x2bc   : > { %v3270_v53 = vpop.f32.mrb[155].mxu1 }
 0x2bd   : > { %v4070_v43 = vadd.f32 %v2283_v39, %v2184_v6 }
 0x2c0   : > { %v2158_v33 = vpop.f32.mrb[140].mxu0 }
 0x2c1   : > { %v2288_v12 = vpop.f32.mrb[156].mxu1  ;;  %v2185_v28 = vadd.f32 %v2158_v33, %v2055_v16  ;;  %v3249_v51 = vpop.f32.mrb[141].mxu0 }
 0x2c2   : > { %v3273_v45 = vpop.f32.mrb[157].mxu1  ;;  %v2161_v46 = vpop.f32.mrb[142].mxu0 }
 0x2c3   : > { %v2291_v24 = vpop.f32.mrb[158].mxu1  ;;  %v4072_v49 = vadd.f32 %v2288_v12, %v2185_v28  ;;  %v2186_v15 = vadd.f32 %v2161_v46, %v2056_v60  ;;  %v3250_v54 = vpop.f32.mrb[143].mxu0 }
 0x2c4   : > { %v3274_v52 = vpop.f32.mrb[159].mxu1 }
 0x2c5   : > { %v4074_v55 = vadd.f32 %v2291_v24, %v2186_v15 }
 0x2c8   : > { %v2166_v19 = vpop.f32.mrb[144].mxu0 }
 0x2c9   : > { %v2296_v27 = vpop.f32.mrb[160].mxu1  ;;  %v2187_v26 = vadd.f32 %v2166_v19, %v2057_v50  ;;  %v3253_v0 = vpop.f32.mrb[145].mxu0 }
 0x2ca   : > { %v3277_v3 = vpop.f32.mrb[161].mxu1  ;;  %v2169_v47 = vpop.f32.mrb[146].mxu0 }
 0x2cb   : > { %v2299_v59 = vpop.f32.mrb[162].mxu1  ;;  %v4076_v58 = vadd.f32 %v2296_v27, %v2187_v26  ;;  %v2188_v16 = vadd.f32 %v2169_v47, %v2058_v41  ;;  %v3254_v61 = vpop.f32.mrb[147].mxu0 }
 0x2cc   : > { %v3278_v14 = vpop.f32.mrb[163].mxu1 }
 0x2cd   : > { %v4078_v7 = vadd.f32 %v2299_v59, %v2188_v16 }
 0x2d0   : > { %v2174_v42 = vpop.f32.mrb[148].mxu0 }
 0x2d1   : > { %v2304_v60 = vpop.f32.mrb[164].mxu1  ;;  %v2189_v2 = vadd.f32 %v2174_v42, %v2059_v1  ;;  %v3257_v30 = vpop.f32.mrb[149].mxu0 }
 0x2d2   : > { %v3281_v23 = vpop.f32.mrb[165].mxu1  ;;  %v2177_v13 = vpop.f32.mrb[150].mxu0 }
 0x2d3   : > { %v2307_v4 = vpop.f32.mrb[166].mxu1  ;;  %v4080_v40 = vadd.f32 %v2304_v60, %v2189_v2  ;;  %v2190_v50 = vadd.f32 %v2177_v13, %v2060_v11  ;;  %v3258_v35 = vpop.f32.mrb[151].mxu0 }
 0x2d4   : > { %v3282_v62 = vpop.f32.mrb[167].mxu1 }
 0x2d5   : > { %v4082_v18 = vadd.f32 %v2307_v4, %v2190_v50 }
 0x2d8   : > { %v2402_v41 = vpop.f32.mrb[152].mxu0 }
 0x2d9   : > { %v2441_v56 = vadd.f32 %v2402_v41, %v2311_v44  ;;  %v3289_v1 = vpop.f32.mrb[153].mxu0 }
 0x2da   : > { %v2405_v36 = vpop.f32.mrb[154].mxu0 }
 0x2db   : > { %v2458_v25 = vadd.f32 %v4087_v63, %v2441_v56  ;;  %v2442_v32 = vadd.f32 %v2405_v36, %v2312_v5  ;;  %v3290_v57 = vpop.f32.mrb[155].mxu0 }
 0x2dd   : > { %vm2468_vm13 = vcmp.ge.f32.partialorder %v2458_v25, 0.0  ;;  %v2478_v21 = vmul.f32 0.2, %v2458_v25  ;;  %v2459_v11 = vadd.f32 %v4087_v63, %v2442_v32 }
 0x2df   : > { %v2488_v39 = vsel %vm2468_vm13, %v2458_v25, %v2478_v21  ;;  %vm2469_vm14 = vcmp.ge.f32.partialorder %v2459_v11, 0.0  ;;  %v2479_v6 = vmul.f32 0.2, %v2459_v11 }
 0x2e0   : > { %v2498_v38 = vmul.f32 1.4142135, %v2488_v39  ;;  %v2410_v53 = vpop.f32.mrb[156].mxu0 }
 0x2e1   : > { %v2489_v33 = vsel %vm2469_vm14, %v2459_v11, %v2479_v6  ;;  %v2443_v12 = vadd.f32 %v2410_v53, %v2313_v34  ;;  %v3293_v28 = vpop.f32.mrb[157].mxu0 }
 0x2e2   : > { %v2508_v44 = vadd.f32 %v2498_v38, %v3869_v8  ;;  %v2499_v51 = vmul.f32 1.4142135, %v2489_v33  ;;  %v2413_v45 = vpop.f32.mrb[158].mxu0 }
 0x2e3   : > { %v2460_v5 = vadd.f32 %v4087_v63, %v2443_v12  ;;  %v2444_v46 = vadd.f32 %v2413_v45, %v4070_v43  ;;  %v3294_v24 = vpop.f32.mrb[159].mxu0 }
 0x2e4   : > { %v2518_v15 = vmul.f32 0.70710677, %v2508_v44  ;;  %v2509_v34 = vadd.f32 %v2499_v51, %v3875_v9 }
 0x2e5   : > { %vm2470_vm0 = vcmp.ge.f32.partialorder %v2460_v5, 0.0  ;;  %v2480_v8 = vmul.f32 0.2, %v2460_v5  ;;  %v2461_v54 = vadd.f32 %v4087_v63, %v2444_v46 }
 0x2e6   : > { %2529 = vst.msk [vmem:[%s4096_s19] sm:$0xff] %vm2528_vm15, %v2518_v15  ;;  %v2519_v52 = vmul.f32 0.70710677, %v2509_v34 }
 0x2e7   : > { %v2490_v19 = vsel %vm2470_vm0, %v2460_v5, %v2480_v8  ;;  %vm2471_vm1 = vcmp.ge.f32.partialorder %v2461_v54, 0.0  ;;  %v2481_v27 = vmul.f32 0.2, %v2461_v54 }
 0x2e8   : > { %2530 = vst.msk [vmem:[%s4096_s19 + $0x8] sm:$0xff] %vm2528_vm15, %v2519_v52  ;;  %v2500_v26 = vmul.f32 1.4142135, %v2490_v19  ;;  %v2418_v0 = vpop.f32.mrb[160].mxu0 }
 0x2e9   : > { %v2491_v43 = vsel %vm2471_vm1, %v2461_v54, %v2481_v27  ;;  %v2445_v3 = vadd.f32 %v2418_v0, %v4072_v49  ;;  %v3297_v47 = vpop.f32.mrb[161].mxu0 }
 0x2ea   : > { %v2510_v9 = vadd.f32 %v2500_v26, %v3886_v22  ;;  %v2501_v59 = vmul.f32 1.4142135, %v2491_v43  ;;  %v2421_v16 = vpop.f32.mrb[162].mxu0 }
 0x2eb   : > { %v2462_v61 = vadd.f32 %v4087_v63, %v2445_v3  ;;  %v2446_v14 = vadd.f32 %v2421_v16, %v4074_v55  ;;  %v3298_v42 = vpop.f32.mrb[163].mxu0 }
 0x2ec   : > { %v2520_v60 = vmul.f32 0.70710677, %v2510_v9  ;;  %v2511_v2 = vadd.f32 %v2501_v59, %v3890_v31 }
 0x2ed   : > { %vm2472_vm2 = vcmp.ge.f32.partialorder %v2462_v61, 0.0  ;;  %v2482_v30 = vmul.f32 0.2, %v2462_v61  ;;  %v2463_v23 = vadd.f32 %v4087_v63, %v2446_v14 }
 0x2ee   : > { %2531 = vst.msk [vmem:[%s4096_s19 + $0x10] sm:$0xff] %vm2528_vm15, %v2520_v60  ;;  %v2521_v49 = vmul.f32 0.70710677, %v2511_v2 }
 0x2ef   : > { %v2492_v13 = vsel %vm2472_vm2, %v2462_v61, %v2482_v30  ;;  %vm2473_vm3 = vcmp.ge.f32.partialorder %v2463_v23, 0.0  ;;  %v2483_v22 = vmul.f32 0.2, %v2463_v23 }
 0x2f0   : > { %2532 = vst.msk [vmem:[%s4096_s19 + $0x18] sm:$0xff] %vm2528_vm15, %v2521_v49  ;;  %v2502_v4 = vmul.f32 1.4142135, %v2492_v13  ;;  %v2426_v50 = vpop.f32.mrb[164].mxu0 }
 0x2f1   : > { %v2493_v55 = vsel %vm2473_vm3, %v2463_v23, %v2483_v22  ;;  %v2447_v35 = vadd.f32 %v2426_v50, %v4076_v58  ;;  %v3301_v62 = vpop.f32.mrb[165].mxu0 }
 0x2f2   : > { %v2512_v31 = vadd.f32 %v2502_v4, %v3900_v20  ;;  %v2503_v41 = vmul.f32 1.4142135, %v2493_v55  ;;  %v2429_v56 = vpop.f32.mrb[166].mxu0 }
 0x2f3   : > { %v2464_v1 = vadd.f32 %v4087_v63, %v2447_v35  ;;  %v2448_v36 = vadd.f32 %v2429_v56, %v4078_v7  ;;  %v3302_v25 = vpop.f32.mrb[167].mxu0 }
 0x2f4   : > { %v2522_v32 = vmul.f32 0.70710677, %v2512_v31  ;;  %v2513_v57 = vadd.f32 %v2503_v41, %v3903_v29 }
 0x2f5   : > { %vm2474_vm4 = vcmp.ge.f32.partialorder %v2464_v1, 0.0  ;;  %v2484_v21 = vmul.f32 0.2, %v2464_v1  ;;  %v2465_v11 = vadd.f32 %v4087_v63, %v2448_v36 }
 0x2f6   : > { %2533 = vst.msk [vmem:[%s4096_s19 + $0x20] sm:$0xff] %vm2528_vm15, %v2522_v32  ;;  %v2523_v58 = vmul.f32 0.70710677, %v2513_v57 }
 0x2f7   : > { %v2494_v39 = vsel %vm2474_vm4, %v2464_v1, %v2484_v21  ;;  %vm2475_vm5 = vcmp.ge.f32.partialorder %v2465_v11, 0.0  ;;  %v2485_v20 = vmul.f32 0.2, %v2465_v11 }
 0x2f8   : > { %2534 = vst.msk [vmem:[%s4096_s19 + $0x28] sm:$0xff] %vm2528_vm15, %v2523_v58  ;;  %v2504_v6 = vmul.f32 1.4142135, %v2494_v39  ;;  %v2434_v38 = vpop.f32.mrb[168].mxu0 }
 0x2f9   : > { %v2495_v7 = vsel %vm2475_vm5, %v2465_v11, %v2485_v20  ;;  %v2449_v53 = vadd.f32 %v2434_v38, %v4080_v40  ;;  %v3305_v33 = vpop.f32.mrb[169].mxu0 }
 0x2fa   : > { %v2514_v29 = vadd.f32 %v2504_v6, %v3912_v10  ;;  %v2505_v12 = vmul.f32 1.4142135, %v2495_v7  ;;  %v2437_v28 = vpop.f32.mrb[170].mxu0 }
 0x2fb   : > { %v2466_v44 = vadd.f32 %v4087_v63, %v2449_v53  ;;  %v2450_v51 = vadd.f32 %v2437_v28, %v4082_v18  ;;  %v3306_v45 = vpop.f32.mrb[171].mxu0 }
 0x2fc   : > { %v2524_v5 = vmul.f32 0.70710677, %v2514_v29  ;;  %v2515_v46 = vadd.f32 %v2505_v12, %v3918_v48 }
 0x2fd   : > { %vm2476_vm6 = vcmp.ge.f32.partialorder %v2466_v44, 0.0  ;;  %v2486_v24 = vmul.f32 0.2, %v2466_v44  ;;  %v2467_v40 = vadd.f32 %v4087_v63, %v2450_v51 }
 0x2fe   : > { %2535 = vst.msk [vmem:[%s4096_s19 + $0x30] sm:$0xff] %vm2528_vm15, %v2524_v5  ;;  %v2525_v10 = vmul.f32 0.70710677, %v2515_v46 }
 0x2ff   : > { %v2496_v15 = vsel %vm2476_vm6, %v2466_v44, %v2486_v24  ;;  %vm2477_vm7 = vcmp.ge.f32.partialorder %v2467_v40, 0.0  ;;  %v2487_v34 = vmul.f32 0.2, %v2467_v40 }
 0x300   : > { %2536 = vst.msk [vmem:[%s4096_s19 + $0x38] sm:$0xff] %vm2528_vm15, %v2525_v10  ;;  %v2506_v8 = vmul.f32 1.4142135, %v2496_v15 }
 0x301   : > { %v2497_v18 = vsel %vm2477_vm7, %v2467_v40, %v2487_v34 }
 0x302   : > { %v2516_v54 = vadd.f32 %v2506_v8, %v3937_v17  ;;  %v2507_v52 = vmul.f32 1.4142135, %v2497_v18 }
 0x304   : > { %v2526_v48 = vmul.f32 0.70710677, %v2516_v54  ;;  %v2517_v19 = vadd.f32 %v2507_v52, %v3941_v37 }
 0x306   : > { %2537 = vst.msk [vmem:[%s4096_s19 + $0x40] sm:$0xff] %vm2528_vm15, %v2526_v48  ;;  %v2527_v27 = vmul.f32 0.70710677, %v2517_v19 }
 0x308   : > { %2538 = vst.msk [vmem:[%s4096_s19 + $0x48] sm:$0xff] %vm2528_vm15, %v2527_v27 }
 0x309 PF: > { %s17_s24 = sadd.s32 1, %s3366_s24  }
 0x30a   : > { %p14_p4 = scmp.ge.s32.totalorder %s17_s24, 4  }
 0x30c   :  { %16 = sbr.rel (!%p14_p4) target bundleno = 1 (0x1), region = 92 }

</bundles_post_ra>
